<compile_context>
chip_gen: v7x
topology: tpu7x:2x2x1
jax: 0.10.0
libtpu: 0.0.40
codegen_flags: <defaults>
</compile_context>

<pallas_src>
import functools
import math

import jax
import jax.numpy as jnp
from jax.experimental import pallas as pl
from jax.experimental.pallas import tpu as pltpu

_NEG_INF = float(jnp.finfo(jnp.float32).min)
_HI = jax.lax.Precision.HIGHEST


# ---------------------------------------------------------------------------
# tiling helpers
# ---------------------------------------------------------------------------
def _row_tile(rows, pref=256):
    """Largest row tile <= pref that divides `rows` (multiple of 8 unless full)."""
    if rows <= pref:
        return rows
    for t in range(pref, 7, -1):
        if rows % t == 0 and t % 8 == 0:
            return t
    return rows


def _col_tile(cols, pref=512):
    """Largest col tile <= pref that divides `cols` (multiple of 128 unless full)."""
    if cols <= pref:
        return cols
    for t in range(pref, 127, -1):
        if cols % t == 0 and t % 128 == 0:
            return t
    return cols


# ---------------------------------------------------------------------------
# kernels
# ---------------------------------------------------------------------------
def _ln_qkv_kernel(x_ref, g_ref, b_ref, w_ref, o_ref, *, eps):
    """Fused LayerNorm + (QKV) projection: o = LN(x) @ W."""
    x = x_ref[...]                                   # (tm, H)
    mean = jnp.mean(x, axis=-1, keepdims=True)
    xc = x - mean
    var = jnp.mean(xc * xc, axis=-1, keepdims=True)
    h = xc * jax.lax.rsqrt(var + eps) * g_ref[...] + b_ref[...]
    o_ref[...] = jnp.dot(h.astype(x.dtype), w_ref[...],
                         preferred_element_type=jnp.float32).astype(o_ref.dtype)


def _out_proj_kernel(x_ref, w_ref, b_ref, r_ref, o_ref):
    """Attention out-projection: o = x @ W_o + b_o + residual."""
    y = jnp.dot(x_ref[...], w_ref[...], preferred_element_type=jnp.float32)
    o_ref[...] = (y + b_ref[...] + r_ref[...]).astype(o_ref.dtype)


def _ln_mlp_kernel(x_ref, g_ref, b_ref, w1_ref, b1_ref, w2_ref, b2_ref, o_ref,
                   *, eps):
    """Fused LayerNorm + MLP + residual: o = x + W2(gelu(W1(LN(x))+b1))+b2."""
    x = x_ref[...]                                   # (tm, H) - also residual
    mean = jnp.mean(x, axis=-1, keepdims=True)
    xc = x - mean
    var = jnp.mean(xc * xc, axis=-1, keepdims=True)
    h = xc * jax.lax.rsqrt(var + eps) * g_ref[...] + b_ref[...]
    a = jnp.dot(h.astype(x.dtype), w1_ref[...],
                preferred_element_type=jnp.float32) + b1_ref[...]
    a = jax.nn.gelu(a, approximate=True)
    y = jnp.dot(a.astype(x.dtype), w2_ref[...],
                preferred_element_type=jnp.float32) + b2_ref[...]
    o_ref[...] = (y + x).astype(o_ref.dtype)


def _attn_kernel(q_ref, k_ref, v_ref, o_ref, *, q_offset, window_size):
    """Masked softmax attention for one batch element, all heads at once."""
    q = q_ref[0]                                     # (nh, Lq, D)
    k = k_ref[0]                                     # (nh, Lk, D)
    v = v_ref[0]                                     # (nh, Lk, D)
    # scores = q @ k^T  (no 1/sqrt(d) scaling, matching the reference module)
    s = jnp.einsum("hqd,hkd->hqk", q, k,
                   preferred_element_type=jnp.float32)   # (nh, Lq, Lk)
    nh, lq, lk = s.shape
    row = jax.lax.broadcasted_iota(jnp.int32, (nh, lq, lk), 1)
    col = jax.lax.broadcasted_iota(jnp.int32, (nh, lq, lk), 2)
    allowed = col <= row + q_offset                  # causal (with kv offset)
    if window_size is not None:                      # local attention window
        allowed = jnp.logical_and(allowed, col > row + q_offset - window_size)
    s = jnp.where(allowed, s, _NEG_INF)
    m = jnp.max(s, axis=-1, keepdims=True)
    p = jnp.exp(s - m)                               # single exp stream on EUP
    p = p / jnp.sum(p, axis=-1, keepdims=True)
    o = jnp.einsum("hqk,hkd->hqd", p.astype(v.dtype), v,
                   preferred_element_type=jnp.float32)
    o_ref[0] = o.astype(o_ref.dtype)


# ---------------------------------------------------------------------------
# pallas_call wrappers
# ---------------------------------------------------------------------------
def _ln_qkv_pallas(x2, g, b, w, eps):
    m, h = x2.shape
    n = w.shape[1]
    tm, tn = _row_tile(m), _col_tile(n)
    return pl.pallas_call(
        functools.partial(_ln_qkv_kernel, eps=eps),
        out_shape=jax.ShapeDtypeStruct((m, n), x2.dtype),
        grid=(m // tm, n // tn),
        in_specs=[pl.BlockSpec((tm, h), lambda i, j: (i, 0)),
                  pl.BlockSpec((1, h), lambda i, j: (0, 0)),
                  pl.BlockSpec((1, h), lambda i, j: (0, 0)),
                  pl.BlockSpec((h, tn), lambda i, j: (0, j))],
        out_specs=pl.BlockSpec((tm, tn), lambda i, j: (i, j)),
        compiler_params=pltpu.CompilerParams(
            dimension_semantics=("parallel", "parallel")),
    )(x2, g.reshape(1, h), b.reshape(1, h), w)


def _out_proj_pallas(x, w, b, residual):
    m, k = x.shape
    n = w.shape[1]
    tm, tn = _row_tile(m), _col_tile(n)
    return pl.pallas_call(
        _out_proj_kernel,
        out_shape=jax.ShapeDtypeStruct((m, n), x.dtype),
        grid=(m // tm, n // tn),
        in_specs=[pl.BlockSpec((tm, k), lambda i, j: (i, 0)),
                  pl.BlockSpec((k, tn), lambda i, j: (0, j)),
                  pl.BlockSpec((1, tn), lambda i, j: (0, j)),
                  pl.BlockSpec((tm, tn), lambda i, j: (i, j))],
        out_specs=pl.BlockSpec((tm, tn), lambda i, j: (i, j)),
        compiler_params=pltpu.CompilerParams(
            dimension_semantics=("parallel", "parallel")),
    )(x, w, b.reshape(1, n), residual)


def _ln_mlp_pallas(x, g, b, w1, b1, w2, b2, eps):
    m, h = x.shape
    inner = w1.shape[1]
    tm = _row_tile(m)
    return pl.pallas_call(
        functools.partial(_ln_mlp_kernel, eps=eps),
        out_shape=jax.ShapeDtypeStruct((m, h), x.dtype),
        grid=(m // tm,),
        in_specs=[pl.BlockSpec((tm, h), lambda i: (i, 0)),
                  pl.BlockSpec((1, h), lambda i: (0, 0)),
                  pl.BlockSpec((1, h), lambda i: (0, 0)),
                  pl.BlockSpec((h, inner), lambda i: (0, 0)),
                  pl.BlockSpec((1, inner), lambda i: (0, 0)),
                  pl.BlockSpec((inner, h), lambda i: (0, 0)),
                  pl.BlockSpec((1, h), lambda i: (0, 0))],
        out_specs=pl.BlockSpec((tm, h), lambda i: (i, 0)),
        compiler_params=pltpu.CompilerParams(dimension_semantics=("parallel",)),
    )(x, g.reshape(1, h), b.reshape(1, h), w1, b1.reshape(1, inner),
      w2, b2.reshape(1, h))


def _attention_pallas(q, k, v, *, q_offset, window_size):
    b, nh, lq, d = q.shape
    lk = k.shape[2]
    return pl.pallas_call(
        functools.partial(_attn_kernel, q_offset=q_offset,
                          window_size=window_size),
        out_shape=jax.ShapeDtypeStruct((b, nh, lq, d), q.dtype),
        grid=(b,),
        in_specs=[pl.BlockSpec((1, nh, lq, d), lambda i: (i, 0, 0, 0)),
                  pl.BlockSpec((1, nh, lk, d), lambda i: (i, 0, 0, 0)),
                  pl.BlockSpec((1, nh, lk, d), lambda i: (i, 0, 0, 0))],
        out_specs=pl.BlockSpec((1, nh, lq, d), lambda i: (i, 0, 0, 0)),
        compiler_params=pltpu.CompilerParams(dimension_semantics=("parallel",)),
    )(q, k, v)


# ---------------------------------------------------------------------------
# op dispatch (Pallas kernel path vs pure-JAX reference path)
# ---------------------------------------------------------------------------
def _layer_norm_ref(x, g, b, eps):
    mean = jnp.mean(x, axis=-1, keepdims=True)
    xc = x - mean
    var = jnp.mean(xc * xc, axis=-1, keepdims=True)
    return xc * jax.lax.rsqrt(var + eps) * g + b


def _ln_qkv(x2, g, b, w, eps, use_pallas):
    if use_pallas:
        return _ln_qkv_pallas(x2, g, b, w, eps)
    return jnp.dot(_layer_norm_ref(x2, g, b, eps), w, precision=_HI)


def _out_proj(x, w, b, residual, use_pallas):
    if use_pallas:
        return _out_proj_pallas(x, w, b, residual)
    return jnp.dot(x, w, precision=_HI) + b + residual


def _ln_mlp(x, g, b, w1, b1, w2, b2, eps, use_pallas):
    if use_pallas:
        return _ln_mlp_pallas(x, g, b, w1, b1, w2, b2, eps)
    h = _layer_norm_ref(x, g, b, eps)
    a = jax.nn.gelu(jnp.dot(h, w1, precision=_HI) + b1, approximate=True)
    return jnp.dot(a, w2, precision=_HI) + b2 + x


def _attention(q, k, v, *, q_offset, window_size, use_pallas):
    if use_pallas:
        return _attention_pallas(q, k, v, q_offset=q_offset,
                                 window_size=window_size)
    s = jnp.einsum("bhqd,bhkd->bhqk", q, k, precision=_HI)
    lq, lk = s.shape[-2], s.shape[-1]
    row = jnp.arange(lq)[:, None]
    col = jnp.arange(lk)[None, :]
    allowed = col <= row + q_offset
    if window_size is not None:
        allowed = jnp.logical_and(allowed, col > row + q_offset - window_size)
    s = jnp.where(allowed[None, None], s, _NEG_INF)
    p = jax.nn.softmax(s, axis=-1)
    return jnp.einsum("bhqk,bhkd->bhqd", p, v, precision=_HI)


# ---------------------------------------------------------------------------
# module-level composition (InnerBlock / StructuredTransformerBlock)
# ---------------------------------------------------------------------------
def inner_block(x, p, *, num_heads, head_dim, window_size=None,
                static_kv_first=False, eps=1e-5, use_pallas=True):
    """InnerBlock.forward: LN -> MHA -> out-proj(+residual) -> LN -> MLP(+residual)."""
    bsz, length, hidden = x.shape
    lq = length - 1 if static_kv_first else length
    residual = x[:, 1:, :] if static_kv_first else x

    # --- InnerAttention: fused layer norm + QKV projection ---
    qkv = _ln_qkv(x.reshape(bsz * length, hidden),
                  p["ln_attn_g"], p["ln_attn_b"], p["w_qkv"], eps, use_pallas)
    qkv = qkv.reshape(bsz, length, 3, num_heads, head_dim).transpose(2, 0, 3, 1, 4)
    q, k, v = qkv[0], qkv[1], qkv[2]                 # (B, nh, L, D)
    if static_kv_first:        # history embedding is KV-only (query dropped)
        q = q[:, :, 1:, :]
    ctx = _attention(q, k, v, q_offset=length - lq, window_size=window_size,
                     use_pallas=use_pallas)
    ctx = ctx.transpose(0, 2, 1, 3).reshape(bsz * lq, hidden)

    # out-proj + bias + residual (fused)
    attn_out = _out_proj(ctx, p["w_o"], p["b_o"],
                         residual.reshape(bsz * lq, hidden), use_pallas)

    # --- fused LayerNorm + MLP + residual ---
    out = _ln_mlp(attn_out, p["ln_mlp_g"], p["ln_mlp_b"],
                  p["w_fc"], p["b_fc"], p["w_proj"], p["b_proj"],
                  eps, use_pallas)
    return out.reshape(bsz, lq, hidden)


def structured_transformer_block(x, params, *, num_heads, head_dim,
                                 seq_window_size, eps=1e-5, use_pallas=True):
    """StructuredTransformerBlock.forward on hidden_states (B, S, dep_len, H)."""
    # TODO(synk): StructuredAttention's source was not provided with the spec; the
    # composition below follows the EventStream nested-attention scheme (sum-pool
    # each event's dep-graph elements, causal local seq block over events, prepend
    # the previous event's contextualized embedding to each event's dep-graph
    # elements and run the dep-graph block with static_kv_first=True).
    bsz, seq_len, dep_len, hidden = x.shape

    # 1) summarize each event
    event_embed = jnp.sum(x, axis=2)                              # (B, S, H)

    # 2) sequential block (causal, local window)
    seq_out = inner_block(event_embed, params["seq"], num_heads=num_heads,
                          head_dim=head_dim, window_size=seq_window_size,
                          static_kv_first=False, eps=eps, use_pallas=use_pallas)

    # 3) history embedding for event i = contextualized embedding of event i-1
    history = jnp.concatenate([jnp.zeros_like(seq_out[:, :1]), seq_out[:, :-1]],
                              axis=1)                             # (B, S, H)

    # 4) dependency-graph block with history prepended (KV only)
    dep_in = jnp.concatenate([history[:, :, None, :], x], axis=2)
    dep_in = dep_in.reshape(bsz * seq_len, dep_len + 1, hidden)
    dep_out = inner_block(dep_in, params["dep"], num_heads=num_heads,
                          head_dim=head_dim, window_size=None,
                          static_kv_first=True, eps=eps, use_pallas=use_pallas)
    return dep_out.reshape(bsz, seq_len, dep_len, hidden)


# ---------------------------------------------------------------------------
# parameters
# ---------------------------------------------------------------------------
def init_inner_block_params(key, hidden, intermediate, std=0.02):
    ks = jax.random.split(key, 7)
    f32 = jnp.float32
    return {
        "ln_attn_g": jnp.ones((hidden,), f32),
        "ln_attn_b": jnp.zeros((hidden,), f32),
        "w_qkv": std * jax.random.normal(ks[0], (hidden, 3 * hidden), f32),
        "w_o": std * jax.random.normal(ks[1], (hidden, hidden), f32),
        "b_o": std * jax.random.normal(ks[2], (hidden,), f32),
        "ln_mlp_g": jnp.ones((hidden,), f32),
        "ln_mlp_b": jnp.zeros((hidden,), f32),
        "w_fc": std * jax.random.normal(ks[3], (hidden, intermediate), f32),
        "b_fc": std * jax.random.normal(ks[4], (intermediate,), f32),
        "w_proj": std * jax.random.normal(ks[5], (intermediate, hidden), f32),
        "b_proj": std * jax.random.normal(ks[6], (hidden,), f32),
    }


# ---------------------------------------------------------------------------
# demo / self-check
# ---------------------------------------------------------------------------
if __name__ == "__main__":
    batch, seq_len, dep_len = 2, 8, 4
    hidden, num_heads = 32, 4
    head_dim = hidden // num_heads
    intermediate = 4 * hidden
    seq_window = 4                       # 'local' seq attention window

    key = jax.random.PRNGKey(0)
    kx, kseq, kdep = jax.random.split(key, 3)
    x = jax.random.normal(kx, (batch, seq_len, dep_len, hidden), jnp.float32)
    params = {
        "seq": init_inner_block_params(kseq, hidden, intermediate),
        "dep": init_inner_block_params(kdep, hidden, intermediate),
    }

    fwd = jax.jit(functools.partial(
        structured_transformer_block, num_heads=num_heads, head_dim=head_dim,
        seq_window_size=seq_window, use_pallas=True))
    out = jax.block_until_ready(fwd(x, params))

    ref = structured_transformer_block(
        x, params, num_heads=num_heads, head_dim=head_dim,
        seq_window_size=seq_window, use_pallas=False)

    assert out.shape == (batch, seq_len, dep_len, hidden)
    assert bool(jnp.all(jnp.isfinite(out)))
    max_err = float(jnp.max(jnp.abs(out - ref)))
    assert max_err < 2e-2, f"mismatch vs pure-JAX reference: max_err={max_err}"

    print("KERNEL_OK")
</pallas_src>

<mosaic_0001>
module attributes {stable_mosaic.version = 11 : i64} {
  func.func @_ln_qkv_kernel(%arg0: i32, %arg1: i32, %arg2: memref<16x32xf32, #tpu.memory_space<vmem>>, %arg3: memref<1x32xf32, #tpu.memory_space<vmem>>, %arg4: memref<1x32xf32, #tpu.memory_space<vmem>>, %arg5: memref<32x96xf32, #tpu.memory_space<vmem>>, %arg6: memref<16x96xf32, #tpu.memory_space<vmem>>) attributes {dimension_semantics = [#tpu.dimension_semantics<parallel>, #tpu.dimension_semantics<parallel>], iteration_bounds = array<i64: 1, 1>, scalar_prefetch = 0 : i64, scratch_operands = 0 : i64, tpu.core_type = #tpu.core_type<tc>, window_params = [{transform_indices = @transform_0, window_bounds = array<i64: 16, 32>}, {pipeline_mode = #tpu.pipeline_mode<synchronous>, transform_indices = @transform_1, window_bounds = array<i64: 1, 32>}, {pipeline_mode = #tpu.pipeline_mode<synchronous>, transform_indices = @transform_2, window_bounds = array<i64: 1, 32>}, {transform_indices = @transform_3, window_bounds = array<i64: 32, 96>}, {transform_indices = @transform_4, window_bounds = array<i64: 16, 96>}]} {
    %c0 = arith.constant 0 : index
    %c0_0 = arith.constant 0 : index
    %0 = vector.load %arg2[%c0, %c0_0] : memref<16x32xf32, #tpu.memory_space<vmem>>, vector<16x32xf32>
    %cst = arith.constant dense<0.000000e+00> : vector<16xf32>
    %1 = vector.multi_reduction <add>, %0, %cst [1] : vector<16x32xf32> to vector<16xf32>
    %2 = vector.shape_cast %1 : vector<16xf32> to vector<16x1xf32>
    %cst_1 = arith.constant 3.200000e+01 : f32
    %3 = vector.broadcast %cst_1 : f32 to vector<16x1xf32>
    %4 = arith.divf %2, %3 : vector<16x1xf32>
    %5 = vector.broadcast %4 : vector<16x1xf32> to vector<16x32xf32>
    %6 = arith.subf %0, %5 : vector<16x32xf32>
    %7 = arith.mulf %6, %6 : vector<16x32xf32>
    %cst_2 = arith.constant dense<0.000000e+00> : vector<16xf32>
    %8 = vector.multi_reduction <add>, %7, %cst_2 [1] : vector<16x32xf32> to vector<16xf32>
    %9 = vector.shape_cast %8 : vector<16xf32> to vector<16x1xf32>
    %cst_3 = arith.constant 3.200000e+01 : f32
    %10 = vector.broadcast %cst_3 : f32 to vector<16x1xf32>
    %11 = arith.divf %9, %10 : vector<16x1xf32>
    %cst_4 = arith.constant 9.99999974E-6 : f32
    %12 = vector.broadcast %cst_4 : f32 to vector<16x1xf32>
    %13 = arith.addf %11, %12 : vector<16x1xf32>
    %14 = math.rsqrt %13 : vector<16x1xf32>
    %15 = vector.broadcast %14 : vector<16x1xf32> to vector<16x32xf32>
    %16 = arith.mulf %6, %15 : vector<16x32xf32>
    %c0_5 = arith.constant 0 : index
    %c0_6 = arith.constant 0 : index
    %17 = vector.load %arg3[%c0_5, %c0_6] : memref<1x32xf32, #tpu.memory_space<vmem>>, vector<1x32xf32>
    %18 = vector.broadcast %17 : vector<1x32xf32> to vector<16x32xf32>
    %19 = arith.mulf %16, %18 : vector<16x32xf32>
    %c0_7 = arith.constant 0 : index
    %c0_8 = arith.constant 0 : index
    %20 = vector.load %arg4[%c0_7, %c0_8] : memref<1x32xf32, #tpu.memory_space<vmem>>, vector<1x32xf32>
    %21 = vector.broadcast %20 : vector<1x32xf32> to vector<16x32xf32>
    %22 = arith.addf %19, %21 : vector<16x32xf32>
    %c0_9 = arith.constant 0 : index
    %c0_10 = arith.constant 0 : index
    %23 = vector.load %arg5[%c0_9, %c0_10] : memref<32x96xf32, #tpu.memory_space<vmem>>, vector<32x96xf32>
    %cst_11 = arith.constant dense<0.000000e+00> : vector<16x96xf32>
    %24 = tpu.matmul %22, %23, %cst_11 {dimension_numbers = #tpu.dot_dimension_numbers<[1], [0], [0], [1], [0, 0, 1, 1], [], []>} : vector<16x32xf32>, vector<32x96xf32>, vector<16x96xf32> -> vector<16x96xf32>
    %c0_12 = arith.constant 0 : index
    %c0_13 = arith.constant 0 : index
    %25 = vector.load %arg6[%c0_12, %c0_13] : memref<16x96xf32, #tpu.memory_space<vmem>>, vector<16x96xf32>
    tpu.vector_store %arg6[%c0_12, %c0_13], %24 {strides = array<i32>} : memref<16x96xf32, #tpu.memory_space<vmem>>, vector<16x96xf32>,
    return
  }
  func.func @transform_0(%arg0: i32, %arg1: i32) -> (i32, i32) {
    %c0_i32 = arith.constant 0 : i32
    %c0_i32_0 = arith.constant 0 : i32
    return %arg0, %c0_i32 : i32, i32
  }
  func.func @transform_1(%arg0: i32, %arg1: i32) -> (i32, i32) {
    %c0_i32 = arith.constant 0 : i32
    %c0_i32_0 = arith.constant 0 : i32
    %c0_i32_1 = arith.constant 0 : i32
    return %c0_i32, %c0_i32_0 : i32, i32
  }
  func.func @transform_2(%arg0: i32, %arg1: i32) -> (i32, i32) {
    %c0_i32 = arith.constant 0 : i32
    %c0_i32_0 = arith.constant 0 : i32
    %c0_i32_1 = arith.constant 0 : i32
    return %c0_i32, %c0_i32_0 : i32, i32
  }
  func.func @transform_3(%arg0: i32, %arg1: i32) -> (i32, i32) {
    %c0_i32 = arith.constant 0 : i32
    %c0_i32_0 = arith.constant 0 : i32
    return %c0_i32, %arg1 : i32, i32
  }
  func.func @transform_4(%arg0: i32, %arg1: i32) -> (i32, i32) {
    %c0_i32 = arith.constant 0 : i32
    return %arg0, %arg1 : i32, i32
  }
}

module attributes {stable_mosaic.version = 11 : i64} {
  func.func @_ln_mlp_kernel(%arg0: i32, %arg1: memref<16x32xf32, #tpu.memory_space<vmem>>, %arg2: memref<1x32xf32, #tpu.memory_space<vmem>>, %arg3: memref<1x32xf32, #tpu.memory_space<vmem>>, %arg4: memref<32x128xf32, #tpu.memory_space<vmem>>, %arg5: memref<1x128xf32, #tpu.memory_space<vmem>>, %arg6: memref<128x32xf32, #tpu.memory_space<vmem>>, %arg7: memref<1x32xf32, #tpu.memory_space<vmem>>, %arg8: memref<16x32xf32, #tpu.memory_space<vmem>>) attributes {dimension_semantics = [#tpu.dimension_semantics<parallel>], iteration_bounds = array<i64: 1>, scalar_prefetch = 0 : i64, scratch_operands = 0 : i64, tpu.core_type = #tpu.core_type<tc>, window_params = [{transform_indices = @transform_0, window_bounds = array<i64: 16, 32>}, {pipeline_mode = #tpu.pipeline_mode<synchronous>, transform_indices = @transform_1, window_bounds = array<i64: 1, 32>}, {pipeline_mode = #tpu.pipeline_mode<synchronous>, transform_indices = @transform_2, window_bounds = array<i64: 1, 32>}, {pipeline_mode = #tpu.pipeline_mode<synchronous>, transform_indices = @transform_3, window_bounds = array<i64: 32, 128>}, {pipeline_mode = #tpu.pipeline_mode<synchronous>, transform_indices = @transform_4, window_bounds = array<i64: 1, 128>}, {pipeline_mode = #tpu.pipeline_mode<synchronous>, transform_indices = @transform_5, window_bounds = array<i64: 128, 32>}, {pipeline_mode = #tpu.pipeline_mode<synchronous>, transform_indices = @transform_6, window_bounds = array<i64: 1, 32>}, {transform_indices = @transform_7, window_bounds = array<i64: 16, 32>}]} {
    %c0 = arith.constant 0 : index
    %c0_0 = arith.constant 0 : index
    %0 = vector.load %arg1[%c0, %c0_0] : memref<16x32xf32, #tpu.memory_space<vmem>>, vector<16x32xf32>
    %cst = arith.constant dense<0.000000e+00> : vector<16xf32>
    %1 = vector.multi_reduction <add>, %0, %cst [1] : vector<16x32xf32> to vector<16xf32>
    %2 = vector.shape_cast %1 : vector<16xf32> to vector<16x1xf32>
    %cst_1 = arith.constant 3.200000e+01 : f32
    %3 = vector.broadcast %cst_1 : f32 to vector<16x1xf32>
    %4 = arith.divf %2, %3 : vector<16x1xf32>
    %5 = vector.broadcast %4 : vector<16x1xf32> to vector<16x32xf32>
    %6 = arith.subf %0, %5 : vector<16x32xf32>
    %7 = arith.mulf %6, %6 : vector<16x32xf32>
    %cst_2 = arith.constant dense<0.000000e+00> : vector<16xf32>
    %8 = vector.multi_reduction <add>, %7, %cst_2 [1] : vector<16x32xf32> to vector<16xf32>
    %9 = vector.shape_cast %8 : vector<16xf32> to vector<16x1xf32>
    %cst_3 = arith.constant 3.200000e+01 : f32
    %10 = vector.broadcast %cst_3 : f32 to vector<16x1xf32>
    %11 = arith.divf %9, %10 : vector<16x1xf32>
    %cst_4 = arith.constant 9.99999974E-6 : f32
    %12 = vector.broadcast %cst_4 : f32 to vector<16x1xf32>
    %13 = arith.addf %11, %12 : vector<16x1xf32>
    %14 = math.rsqrt %13 : vector<16x1xf32>
    %15 = vector.broadcast %14 : vector<16x1xf32> to vector<16x32xf32>
    %16 = arith.mulf %6, %15 : vector<16x32xf32>
    %c0_5 = arith.constant 0 : index
    %c0_6 = arith.constant 0 : index
    %17 = vector.load %arg2[%c0_5, %c0_6] : memref<1x32xf32, #tpu.memory_space<vmem>>, vector<1x32xf32>
    %18 = vector.broadcast %17 : vector<1x32xf32> to vector<16x32xf32>
    %19 = arith.mulf %16, %18 : vector<16x32xf32>
    %c0_7 = arith.constant 0 : index
    %c0_8 = arith.constant 0 : index
    %20 = vector.load %arg3[%c0_7, %c0_8] : memref<1x32xf32, #tpu.memory_space<vmem>>, vector<1x32xf32>
    %21 = vector.broadcast %20 : vector<1x32xf32> to vector<16x32xf32>
    %22 = arith.addf %19, %21 : vector<16x32xf32>
    %c0_9 = arith.constant 0 : index
    %c0_10 = arith.constant 0 : index
    %23 = vector.load %arg4[%c0_9, %c0_10] : memref<32x128xf32, #tpu.memory_space<vmem>>, vector<32x128xf32>
    %cst_11 = arith.constant dense<0.000000e+00> : vector<16x128xf32>
    %24 = tpu.matmul %22, %23, %cst_11 {dimension_numbers = #tpu.dot_dimension_numbers<[1], [0], [0], [1], [0, 0, 1, 1], [], []>} : vector<16x32xf32>, vector<32x128xf32>, vector<16x128xf32> -> vector<16x128xf32>
    %c0_12 = arith.constant 0 : index
    %c0_13 = arith.constant 0 : index
    %25 = vector.load %arg5[%c0_12, %c0_13] : memref<1x128xf32, #tpu.memory_space<vmem>>, vector<1x128xf32>
    %26 = vector.broadcast %25 : vector<1x128xf32> to vector<16x128xf32>
    %27 = arith.addf %24, %26 : vector<16x128xf32>
    %28 = arith.mulf %27, %27 : vector<16x128xf32>
    %29 = arith.mulf %27, %28 : vector<16x128xf32>
    %cst_14 = arith.constant 4.471500e-02 : f32
    %30 = vector.broadcast %cst_14 : f32 to vector<16x128xf32>
    %31 = arith.mulf %30, %29 : vector<16x128xf32>
    %32 = arith.addf %27, %31 : vector<16x128xf32>
    %cst_15 = arith.constant 0.797884583 : f32
    %33 = vector.broadcast %cst_15 : f32 to vector<16x128xf32>
    %34 = arith.mulf %33, %32 : vector<16x128xf32>
    %35 = math.tanh %34 : vector<16x128xf32>
    %cst_16 = arith.constant 1.000000e+00 : f32
    %36 = vector.broadcast %cst_16 : f32 to vector<16x128xf32>
    %37 = arith.addf %36, %35 : vector<16x128xf32>
    %cst_17 = arith.constant 5.000000e-01 : f32
    %38 = vector.broadcast %cst_17 : f32 to vector<16x128xf32>
    %39 = arith.mulf %38, %37 : vector<16x128xf32>
    %40 = arith.mulf %27, %39 : vector<16x128xf32>
    %c0_18 = arith.constant 0 : index
    %c0_19 = arith.constant 0 : index
    %41 = vector.load %arg6[%c0_18, %c0_19] : memref<128x32xf32, #tpu.memory_space<vmem>>, vector<128x32xf32>
    %cst_20 = arith.constant dense<0.000000e+00> : vector<16x32xf32>
    %42 = tpu.matmul %40, %41, %cst_20 {dimension_numbers = #tpu.dot_dimension_numbers<[1], [0], [0], [1], [0, 0, 1, 1], [], []>} : vector<16x128xf32>, vector<128x32xf32>, vector<16x32xf32> -> vector<16x32xf32>
    %c0_21 = arith.constant 0 : index
    %c0_22 = arith.constant 0 : index
    %43 = vector.load %arg7[%c0_21, %c0_22] : memref<1x32xf32, #tpu.memory_space<vmem>>, vector<1x32xf32>
    %44 = vector.broadcast %43 : vector<1x32xf32> to vector<16x32xf32>
    %45 = arith.addf %42, %44 : vector<16x32xf32>
    %46 = arith.addf %45, %0 : vector<16x32xf32>
    %c0_23 = arith.constant 0 : index
    %c0_24 = arith.constant 0 : index
    %47 = vector.load %arg8[%c0_23, %c0_24] : memref<16x32xf32, #tpu.memory_space<vmem>>, vector<16x32xf32>
    tpu.vector_store %arg8[%c0_23, %c0_24], %46 {strides = array<i32>} : memref<16x32xf32, #tpu.memory_space<vmem>>, vector<16x32xf32>,
    return
  }
  func.func @transform_0(%arg0: i32) -> (i32, i32) {
    %c0_i32 = arith.constant 0 : i32
    %c0_i32_0 = arith.constant 0 : i32
    return %arg0, %c0_i32 : i32, i32
  }
  func.func @transform_1(%arg0: i32) -> (i32, i32) {
    %c0_i32 = arith.constant 0 : i32
    %c0_i32_0 = arith.constant 0 : i32
    %c0_i32_1 = arith.constant 0 : i32
    return %c0_i32, %c0_i32_0 : i32, i32
  }
  func.func @transform_2(%arg0: i32) -> (i32, i32) {
    %c0_i32 = arith.constant 0 : i32
    %c0_i32_0 = arith.constant 0 : i32
    %c0_i32_1 = arith.constant 0 : i32
    return %c0_i32, %c0_i32_0 : i32, i32
  }
  func.func @transform_3(%arg0: i32) -> (i32, i32) {
    %c0_i32 = arith.constant 0 : i32
    %c0_i32_0 = arith.constant 0 : i32
    %c0_i32_1 = arith.constant 0 : i32
    return %c0_i32, %c0_i32_0 : i32, i32
  }
  func.func @transform_4(%arg0: i32) -> (i32, i32) {
    %c0_i32 = arith.constant 0 : i32
    %c0_i32_0 = arith.constant 0 : i32
    %c0_i32_1 = arith.constant 0 : i32
    return %c0_i32, %c0_i32_0 : i32, i32
  }
  func.func @transform_5(%arg0: i32) -> (i32, i32) {
    %c0_i32 = arith.constant 0 : i32
    %c0_i32_0 = arith.constant 0 : i32
    %c0_i32_1 = arith.constant 0 : i32
    return %c0_i32, %c0_i32_0 : i32, i32
  }
  func.func @transform_6(%arg0: i32) -> (i32, i32) {
    %c0_i32 = arith.constant 0 : i32
    %c0_i32_0 = arith.constant 0 : i32
    %c0_i32_1 = arith.constant 0 : i32
    return %c0_i32, %c0_i32_0 : i32, i32
  }
  func.func @transform_7(%arg0: i32) -> (i32, i32) {
    %c0_i32 = arith.constant 0 : i32
    %c0_i32_0 = arith.constant 0 : i32
    return %arg0, %c0_i32 : i32, i32
  }
}

module attributes {stable_mosaic.version = 11 : i64} {
  func.func @_attn_kernel(%arg0: i32, %arg1: memref<1x4x8x8xf32, #tpu.memory_space<vmem>>, %arg2: memref<1x4x8x8xf32, #tpu.memory_space<vmem>>, %arg3: memref<1x4x8x8xf32, #tpu.memory_space<vmem>>, %arg4: memref<1x4x8x8xf32, #tpu.memory_space<vmem>>) attributes {dimension_semantics = [#tpu.dimension_semantics<parallel>], iteration_bounds = array<i64: 2>, scalar_prefetch = 0 : i64, scratch_operands = 0 : i64, tpu.core_type = #tpu.core_type<tc>, window_params = [{transform_indices = @transform_0, window_bounds = array<i64: 1, 4, 8, 8>}, {transform_indices = @transform_1, window_bounds = array<i64: 1, 4, 8, 8>}, {transform_indices = @transform_2, window_bounds = array<i64: 1, 4, 8, 8>}, {transform_indices = @transform_3, window_bounds = array<i64: 1, 4, 8, 8>}]} {
    %c0 = arith.constant 0 : index
    %c0_0 = arith.constant 0 : index
    %c0_1 = arith.constant 0 : index
    %c0_2 = arith.constant 0 : index
    %0 = vector.load %arg1[%c0, %c0_0, %c0_1, %c0_2] : memref<1x4x8x8xf32, #tpu.memory_space<vmem>>, vector<1x4x8x8xf32>
    %1 = vector.shape_cast %0 : vector<1x4x8x8xf32> to vector<4x8x8xf32>
    %c0_3 = arith.constant 0 : index
    %c0_4 = arith.constant 0 : index
    %c0_5 = arith.constant 0 : index
    %c0_6 = arith.constant 0 : index
    %2 = vector.load %arg2[%c0_3, %c0_4, %c0_5, %c0_6] : memref<1x4x8x8xf32, #tpu.memory_space<vmem>>, vector<1x4x8x8xf32>
    %3 = vector.shape_cast %2 : vector<1x4x8x8xf32> to vector<4x8x8xf32>
    %c0_7 = arith.constant 0 : index
    %c0_8 = arith.constant 0 : index
    %c0_9 = arith.constant 0 : index
    %c0_10 = arith.constant 0 : index
    %4 = vector.load %arg3[%c0_7, %c0_8, %c0_9, %c0_10] : memref<1x4x8x8xf32, #tpu.memory_space<vmem>>, vector<1x4x8x8xf32>
    %5 = vector.shape_cast %4 : vector<1x4x8x8xf32> to vector<4x8x8xf32>
    "tpu.trace_start"() <{level = 10 : i32, message = "hqd,hkd->hqk"}> : () -> ()
    %cst = arith.constant dense<0.000000e+00> : vector<4x8x8xf32>
    %6 = tpu.matmul %1, %3, %cst {dimension_numbers = #tpu.dot_dimension_numbers<[2], [2], [1], [1], [0, 0, 0, 1, 1, 1], [0], [0]>} : vector<4x8x8xf32>, vector<4x8x8xf32>, vector<4x8x8xf32> -> vector<4x8x8xf32>
    "tpu.trace_stop"() : () -> ()
    %7 = tpu.iota {dimensions = array<i32: 1>} : vector<4x8x8xi32>
    %8 = tpu.iota {dimensions = array<i32: 2>} : vector<4x8x8xi32>
    %c0_i32 = arith.constant 0 : i32
    %9 = vector.broadcast %c0_i32 : i32 to vector<4x8x8xi32>
    %10 = arith.addi %7, %9 : vector<4x8x8xi32>
    %11 = arith.cmpi sle, %8, %10 : vector<4x8x8xi32>
    %c0_i32_11 = arith.constant 0 : i32
    %12 = vector.broadcast %c0_i32_11 : i32 to vector<4x8x8xi32>
    %13 = arith.addi %7, %12 : vector<4x8x8xi32>
    %c4_i32 = arith.constant 4 : i32
    %14 = vector.broadcast %c4_i32 : i32 to vector<4x8x8xi32>
    %15 = arith.subi %13, %14 : vector<4x8x8xi32>
    %16 = arith.cmpi sgt, %8, %15 : vector<4x8x8xi32>
    %17 = arith.andi %11, %16 : vector<4x8x8xi1>
    %cst_12 = arith.constant -3.40282347E+38 : f32
    %18 = vector.broadcast %cst_12 : f32 to vector<4x8x8xf32>
    %19 = arith.select %17, %6, %18 : vector<4x8x8xi1>, vector<4x8x8xf32>
    %cst_13 = arith.constant dense<0xFF800000> : vector<4x8xf32>
    %20 = vector.multi_reduction <maximumf>, %19, %cst_13 [2] : vector<4x8x8xf32> to vector<4x8xf32>
    %21 = vector.shape_cast %20 : vector<4x8xf32> to vector<4x8x1xf32>
    %22 = vector.broadcast %21 : vector<4x8x1xf32> to vector<4x8x8xf32>
    %23 = arith.subf %19, %22 : vector<4x8x8xf32>
    %24 = math.exp %23 : vector<4x8x8xf32>
    %cst_14 = arith.constant dense<0.000000e+00> : vector<4x8xf32>
    %25 = vector.multi_reduction <add>, %24, %cst_14 [2] : vector<4x8x8xf32> to vector<4x8xf32>
    %26 = vector.shape_cast %25 : vector<4x8xf32> to vector<4x8x1xf32>
    %27 = vector.broadcast %26 : vector<4x8x1xf32> to vector<4x8x8xf32>
    %28 = arith.divf %24, %27 : vector<4x8x8xf32>
    "tpu.trace_start"() <{level = 10 : i32, message = "hqk,hkd->hqd"}> : () -> ()
    %cst_15 = arith.constant dense<0.000000e+00> : vector<4x8x8xf32>
    %29 = tpu.matmul %28, %5, %cst_15 {dimension_numbers = #tpu.dot_dimension_numbers<[2], [1], [1], [2], [0, 0, 0, 1, 1, 2], [0], [0]>} : vector<4x8x8xf32>, vector<4x8x8xf32>, vector<4x8x8xf32> -> vector<4x8x8xf32>
    "tpu.trace_stop"() : () -> ()
    %c0_16 = arith.constant 0 : index
    %c0_17 = arith.constant 0 : index
    %c0_18 = arith.constant 0 : index
    %c0_19 = arith.constant 0 : index
    %30 = vector.load %arg4[%c0_16, %c0_17, %c0_18, %c0_19] : memref<1x4x8x8xf32, #tpu.memory_space<vmem>>, vector<1x4x8x8xf32>
    %31 = vector.shape_cast %30 : vector<1x4x8x8xf32> to vector<4x8x8xf32>
    %32 = vector.shape_cast %29 : vector<4x8x8xf32> to vector<1x4x8x8xf32>
    tpu.vector_store %arg4[%c0_16, %c0_17, %c0_18, %c0_19], %32 {strides = array<i32>} : memref<1x4x8x8xf32, #tpu.memory_space<vmem>>, vector<1x4x8x8xf32>,
    return
  }
  func.func @transform_0(%arg0: i32) -> (i32, i32, i32, i32) {
    %c0_i32 = arith.constant 0 : i32
    %c0_i32_0 = arith.constant 0 : i32
    %c0_i32_1 = arith.constant 0 : i32
    %c0_i32_2 = arith.constant 0 : i32
    return %arg0, %c0_i32, %c0_i32_0, %c0_i32_1 : i32, i32, i32, i32
  }
  func.func @transform_1(%arg0: i32) -> (i32, i32, i32, i32) {
    %c0_i32 = arith.constant 0 : i32
    %c0_i32_0 = arith.constant 0 : i32
    %c0_i32_1 = arith.constant 0 : i32
    %c0_i32_2 = arith.constant 0 : i32
    return %arg0, %c0_i32, %c0_i32_0, %c0_i32_1 : i32, i32, i32, i32
  }
  func.func @transform_2(%arg0: i32) -> (i32, i32, i32, i32) {
    %c0_i32 = arith.constant 0 : i32
    %c0_i32_0 = arith.constant 0 : i32
    %c0_i32_1 = arith.constant 0 : i32
    %c0_i32_2 = arith.constant 0 : i32
    return %arg0, %c0_i32, %c0_i32_0, %c0_i32_1 : i32, i32, i32, i32
  }
  func.func @transform_3(%arg0: i32) -> (i32, i32, i32, i32) {
    %c0_i32 = arith.constant 0 : i32
    %c0_i32_0 = arith.constant 0 : i32
    %c0_i32_1 = arith.constant 0 : i32
    %c0_i32_2 = arith.constant 0 : i32
    return %arg0, %c0_i32, %c0_i32_0, %c0_i32_1 : i32, i32, i32, i32
  }
}

module attributes {stable_mosaic.version = 11 : i64} {
  func.func @_out_proj_kernel(%arg0: i32, %arg1: i32, %arg2: memref<16x32xf32, #tpu.memory_space<vmem>>, %arg3: memref<32x32xf32, #tpu.memory_space<vmem>>, %arg4: memref<1x32xf32, #tpu.memory_space<vmem>>, %arg5: memref<16x32xf32, #tpu.memory_space<vmem>>, %arg6: memref<16x32xf32, #tpu.memory_space<vmem>>) attributes {dimension_semantics = [#tpu.dimension_semantics<parallel>, #tpu.dimension_semantics<parallel>], iteration_bounds = array<i64: 1, 1>, scalar_prefetch = 0 : i64, scratch_operands = 0 : i64, tpu.core_type = #tpu.core_type<tc>, window_params = [{transform_indices = @transform_0, window_bounds = array<i64: 16, 32>}, {transform_indices = @transform_1, window_bounds = array<i64: 32, 32>}, {transform_indices = @transform_2, window_bounds = array<i64: 1, 32>}, {transform_indices = @transform_3, window_bounds = array<i64: 16, 32>}, {transform_indices = @transform_4, window_bounds = array<i64: 16, 32>}]} {
    %c0 = arith.constant 0 : index
    %c0_0 = arith.constant 0 : index
    %0 = vector.load %arg2[%c0, %c0_0] : memref<16x32xf32, #tpu.memory_space<vmem>>, vector<16x32xf32>
    %c0_1 = arith.constant 0 : index
    %c0_2 = arith.constant 0 : index
    %1 = vector.load %arg3[%c0_1, %c0_2] : memref<32x32xf32, #tpu.memory_space<vmem>>, vector<32x32xf32>
    %cst = arith.constant dense<0.000000e+00> : vector<16x32xf32>
    %2 = tpu.matmul %0, %1, %cst {dimension_numbers = #tpu.dot_dimension_numbers<[1], [0], [0], [1], [0, 0, 1, 1], [], []>} : vector<16x32xf32>, vector<32x32xf32>, vector<16x32xf32> -> vector<16x32xf32>
    %c0_3 = arith.constant 0 : index
    %c0_4 = arith.constant 0 : index
    %3 = vector.load %arg4[%c0_3, %c0_4] : memref<1x32xf32, #tpu.memory_space<vmem>>, vector<1x32xf32>
    %4 = vector.broadcast %3 : vector<1x32xf32> to vector<16x32xf32>
    %5 = arith.addf %2, %4 : vector<16x32xf32>
    %c0_5 = arith.constant 0 : index
    %c0_6 = arith.constant 0 : index
    %6 = vector.load %arg5[%c0_5, %c0_6] : memref<16x32xf32, #tpu.memory_space<vmem>>, vector<16x32xf32>
    %7 = arith.addf %5, %6 : vector<16x32xf32>
    %c0_7 = arith.constant 0 : index
    %c0_8 = arith.constant 0 : index
    %8 = vector.load %arg6[%c0_7, %c0_8] : memref<16x32xf32, #tpu.memory_space<vmem>>, vector<16x32xf32>
    tpu.vector_store %arg6[%c0_7, %c0_8], %7 {strides = array<i32>} : memref<16x32xf32, #tpu.memory_space<vmem>>, vector<16x32xf32>,
    return
  }
  func.func @transform_0(%arg0: i32, %arg1: i32) -> (i32, i32) {
    %c0_i32 = arith.constant 0 : i32
    %c0_i32_0 = arith.constant 0 : i32
    return %arg0, %c0_i32 : i32, i32
  }
  func.func @transform_1(%arg0: i32, %arg1: i32) -> (i32, i32) {
    %c0_i32 = arith.constant 0 : i32
    %c0_i32_0 = arith.constant 0 : i32
    return %c0_i32, %arg1 : i32, i32
  }
  func.func @transform_2(%arg0: i32, %arg1: i32) -> (i32, i32) {
    %c0_i32 = arith.constant 0 : i32
    %c0_i32_0 = arith.constant 0 : i32
    return %c0_i32, %arg1 : i32, i32
  }
  func.func @transform_3(%arg0: i32, %arg1: i32) -> (i32, i32) {
    %c0_i32 = arith.constant 0 : i32
    return %arg0, %arg1 : i32, i32
  }
  func.func @transform_4(%arg0: i32, %arg1: i32) -> (i32, i32) {
    %c0_i32 = arith.constant 0 : i32
    return %arg0, %arg1 : i32, i32
  }
}

module attributes {stable_mosaic.version = 11 : i64} {
  func.func @_ln_qkv_kernel(%arg0: i32, %arg1: i32, %arg2: memref<80x32xf32, #tpu.memory_space<vmem>>, %arg3: memref<1x32xf32, #tpu.memory_space<vmem>>, %arg4: memref<1x32xf32, #tpu.memory_space<vmem>>, %arg5: memref<32x96xf32, #tpu.memory_space<vmem>>, %arg6: memref<80x96xf32, #tpu.memory_space<vmem>>) attributes {dimension_semantics = [#tpu.dimension_semantics<parallel>, #tpu.dimension_semantics<parallel>], iteration_bounds = array<i64: 1, 1>, scalar_prefetch = 0 : i64, scratch_operands = 0 : i64, tpu.core_type = #tpu.core_type<tc>, window_params = [{transform_indices = @transform_0, window_bounds = array<i64: 80, 32>}, {pipeline_mode = #tpu.pipeline_mode<synchronous>, transform_indices = @transform_1, window_bounds = array<i64: 1, 32>}, {pipeline_mode = #tpu.pipeline_mode<synchronous>, transform_indices = @transform_2, window_bounds = array<i64: 1, 32>}, {transform_indices = @transform_3, window_bounds = array<i64: 32, 96>}, {transform_indices = @transform_4, window_bounds = array<i64: 80, 96>}]} {
    %c0 = arith.constant 0 : index
    %c0_0 = arith.constant 0 : index
    %0 = vector.load %arg2[%c0, %c0_0] : memref<80x32xf32, #tpu.memory_space<vmem>>, vector<80x32xf32>
    %cst = arith.constant dense<0.000000e+00> : vector<80xf32>
    %1 = vector.multi_reduction <add>, %0, %cst [1] : vector<80x32xf32> to vector<80xf32>
    %2 = vector.shape_cast %1 : vector<80xf32> to vector<80x1xf32>
    %cst_1 = arith.constant 3.200000e+01 : f32
    %3 = vector.broadcast %cst_1 : f32 to vector<80x1xf32>
    %4 = arith.divf %2, %3 : vector<80x1xf32>
    %5 = vector.broadcast %4 : vector<80x1xf32> to vector<80x32xf32>
    %6 = arith.subf %0, %5 : vector<80x32xf32>
    %7 = arith.mulf %6, %6 : vector<80x32xf32>
    %cst_2 = arith.constant dense<0.000000e+00> : vector<80xf32>
    %8 = vector.multi_reduction <add>, %7, %cst_2 [1] : vector<80x32xf32> to vector<80xf32>
    %9 = vector.shape_cast %8 : vector<80xf32> to vector<80x1xf32>
    %cst_3 = arith.constant 3.200000e+01 : f32
    %10 = vector.broadcast %cst_3 : f32 to vector<80x1xf32>
    %11 = arith.divf %9, %10 : vector<80x1xf32>
    %cst_4 = arith.constant 9.99999974E-6 : f32
    %12 = vector.broadcast %cst_4 : f32 to vector<80x1xf32>
    %13 = arith.addf %11, %12 : vector<80x1xf32>
    %14 = math.rsqrt %13 : vector<80x1xf32>
    %15 = vector.broadcast %14 : vector<80x1xf32> to vector<80x32xf32>
    %16 = arith.mulf %6, %15 : vector<80x32xf32>
    %c0_5 = arith.constant 0 : index
    %c0_6 = arith.constant 0 : index
    %17 = vector.load %arg3[%c0_5, %c0_6] : memref<1x32xf32, #tpu.memory_space<vmem>>, vector<1x32xf32>
    %18 = vector.broadcast %17 : vector<1x32xf32> to vector<80x32xf32>
    %19 = arith.mulf %16, %18 : vector<80x32xf32>
    %c0_7 = arith.constant 0 : index
    %c0_8 = arith.constant 0 : index
    %20 = vector.load %arg4[%c0_7, %c0_8] : memref<1x32xf32, #tpu.memory_space<vmem>>, vector<1x32xf32>
    %21 = vector.broadcast %20 : vector<1x32xf32> to vector<80x32xf32>
    %22 = arith.addf %19, %21 : vector<80x32xf32>
    %c0_9 = arith.constant 0 : index
    %c0_10 = arith.constant 0 : index
    %23 = vector.load %arg5[%c0_9, %c0_10] : memref<32x96xf32, #tpu.memory_space<vmem>>, vector<32x96xf32>
    %cst_11 = arith.constant dense<0.000000e+00> : vector<80x96xf32>
    %24 = tpu.matmul %22, %23, %cst_11 {dimension_numbers = #tpu.dot_dimension_numbers<[1], [0], [0], [1], [0, 0, 1, 1], [], []>} : vector<80x32xf32>, vector<32x96xf32>, vector<80x96xf32> -> vector<80x96xf32>
    %c0_12 = arith.constant 0 : index
    %c0_13 = arith.constant 0 : index
    %25 = vector.load %arg6[%c0_12, %c0_13] : memref<80x96xf32, #tpu.memory_space<vmem>>, vector<80x96xf32>
    tpu.vector_store %arg6[%c0_12, %c0_13], %24 {strides = array<i32>} : memref<80x96xf32, #tpu.memory_space<vmem>>, vector<80x96xf32>,
    return
  }
  func.func @transform_0(%arg0: i32, %arg1: i32) -> (i32, i32) {
    %c0_i32 = arith.constant 0 : i32
    %c0_i32_0 = arith.constant 0 : i32
    return %arg0, %c0_i32 : i32, i32
  }
  func.func @transform_1(%arg0: i32, %arg1: i32) -> (i32, i32) {
    %c0_i32 = arith.constant 0 : i32
    %c0_i32_0 = arith.constant 0 : i32
    %c0_i32_1 = arith.constant 0 : i32
    return %c0_i32, %c0_i32_0 : i32, i32
  }
  func.func @transform_2(%arg0: i32, %arg1: i32) -> (i32, i32) {
    %c0_i32 = arith.constant 0 : i32
    %c0_i32_0 = arith.constant 0 : i32
    %c0_i32_1 = arith.constant 0 : i32
    return %c0_i32, %c0_i32_0 : i32, i32
  }
  func.func @transform_3(%arg0: i32, %arg1: i32) -> (i32, i32) {
    %c0_i32 = arith.constant 0 : i32
    %c0_i32_0 = arith.constant 0 : i32
    return %c0_i32, %arg1 : i32, i32
  }
  func.func @transform_4(%arg0: i32, %arg1: i32) -> (i32, i32) {
    %c0_i32 = arith.constant 0 : i32
    return %arg0, %arg1 : i32, i32
  }
}

module attributes {stable_mosaic.version = 11 : i64} {
  func.func @_attn_kernel(%arg0: i32, %arg1: memref<1x4x4x8xf32, #tpu.memory_space<vmem>>, %arg2: memref<1x4x5x8xf32, #tpu.memory_space<vmem>>, %arg3: memref<1x4x5x8xf32, #tpu.memory_space<vmem>>, %arg4: memref<1x4x4x8xf32, #tpu.memory_space<vmem>>) attributes {dimension_semantics = [#tpu.dimension_semantics<parallel>], iteration_bounds = array<i64: 16>, scalar_prefetch = 0 : i64, scratch_operands = 0 : i64, tpu.core_type = #tpu.core_type<tc>, window_params = [{transform_indices = @transform_0, window_bounds = array<i64: 1, 4, 4, 8>}, {transform_indices = @transform_1, window_bounds = array<i64: 1, 4, 5, 8>}, {transform_indices = @transform_2, window_bounds = array<i64: 1, 4, 5, 8>}, {transform_indices = @transform_3, window_bounds = array<i64: 1, 4, 4, 8>}]} {
    %c0 = arith.constant 0 : index
    %c0_0 = arith.constant 0 : index
    %c0_1 = arith.constant 0 : index
    %c0_2 = arith.constant 0 : index
    %0 = vector.load %arg1[%c0, %c0_0, %c0_1, %c0_2] : memref<1x4x4x8xf32, #tpu.memory_space<vmem>>, vector<1x4x4x8xf32>
    %1 = vector.shape_cast %0 : vector<1x4x4x8xf32> to vector<4x4x8xf32>
    %c0_3 = arith.constant 0 : index
    %c0_4 = arith.constant 0 : index
    %c0_5 = arith.constant 0 : index
    %c0_6 = arith.constant 0 : index
    %2 = vector.load %arg2[%c0_3, %c0_4, %c0_5, %c0_6] : memref<1x4x5x8xf32, #tpu.memory_space<vmem>>, vector<1x4x5x8xf32>
    %3 = vector.shape_cast %2 : vector<1x4x5x8xf32> to vector<4x5x8xf32>
    %c0_7 = arith.constant 0 : index
    %c0_8 = arith.constant 0 : index
    %c0_9 = arith.constant 0 : index
    %c0_10 = arith.constant 0 : index
    %4 = vector.load %arg3[%c0_7, %c0_8, %c0_9, %c0_10] : memref<1x4x5x8xf32, #tpu.memory_space<vmem>>, vector<1x4x5x8xf32>
    %5 = vector.shape_cast %4 : vector<1x4x5x8xf32> to vector<4x5x8xf32>
    "tpu.trace_start"() <{level = 10 : i32, message = "hqd,hkd->hqk"}> : () -> ()
    %cst = arith.constant dense<0.000000e+00> : vector<4x4x5xf32>
    %6 = tpu.matmul %1, %3, %cst {dimension_numbers = #tpu.dot_dimension_numbers<[2], [2], [1], [1], [0, 0, 0, 1, 1, 1], [0], [0]>} : vector<4x4x8xf32>, vector<4x5x8xf32>, vector<4x4x5xf32> -> vector<4x4x5xf32>
    "tpu.trace_stop"() : () -> ()
    %7 = tpu.iota {dimensions = array<i32: 1>} : vector<4x4x5xi32>
    %8 = tpu.iota {dimensions = array<i32: 2>} : vector<4x4x5xi32>
    %c1_i32 = arith.constant 1 : i32
    %9 = vector.broadcast %c1_i32 : i32 to vector<4x4x5xi32>
    %10 = arith.addi %7, %9 : vector<4x4x5xi32>
    %11 = arith.cmpi sle, %8, %10 : vector<4x4x5xi32>
    %cst_11 = arith.constant -3.40282347E+38 : f32
    %12 = vector.broadcast %cst_11 : f32 to vector<4x4x5xf32>
    %13 = arith.select %11, %6, %12 : vector<4x4x5xi1>, vector<4x4x5xf32>
    %cst_12 = arith.constant dense<0xFF800000> : vector<4x4xf32>
    %14 = vector.multi_reduction <maximumf>, %13, %cst_12 [2] : vector<4x4x5xf32> to vector<4x4xf32>
    %15 = vector.shape_cast %14 : vector<4x4xf32> to vector<4x4x1xf32>
    %16 = vector.broadcast %15 : vector<4x4x1xf32> to vector<4x4x5xf32>
    %17 = arith.subf %13, %16 : vector<4x4x5xf32>
    %18 = math.exp %17 : vector<4x4x5xf32>
    %cst_13 = arith.constant dense<0.000000e+00> : vector<4x4xf32>
    %19 = vector.multi_reduction <add>, %18, %cst_13 [2] : vector<4x4x5xf32> to vector<4x4xf32>
    %20 = vector.shape_cast %19 : vector<4x4xf32> to vector<4x4x1xf32>
    %21 = vector.broadcast %20 : vector<4x4x1xf32> to vector<4x4x5xf32>
    %22 = arith.divf %18, %21 : vector<4x4x5xf32>
    "tpu.trace_start"() <{level = 10 : i32, message = "hqk,hkd->hqd"}> : () -> ()
    %cst_14 = arith.constant dense<0.000000e+00> : vector<4x4x8xf32>
    %23 = tpu.matmul %22, %5, %cst_14 {dimension_numbers = #tpu.dot_dimension_numbers<[2], [1], [1], [2], [0, 0, 0, 1, 1, 2], [0], [0]>} : vector<4x4x5xf32>, vector<4x5x8xf32>, vector<4x4x8xf32> -> vector<4x4x8xf32>
    "tpu.trace_stop"() : () -> ()
    %c0_15 = arith.constant 0 : index
    %c0_16 = arith.constant 0 : index
    %c0_17 = arith.constant 0 : index
    %c0_18 = arith.constant 0 : index
    %24 = vector.load %arg4[%c0_15, %c0_16, %c0_17, %c0_18] : memref<1x4x4x8xf32, #tpu.memory_space<vmem>>, vector<1x4x4x8xf32>
    %25 = vector.shape_cast %24 : vector<1x4x4x8xf32> to vector<4x4x8xf32>
    %26 = vector.shape_cast %23 : vector<4x4x8xf32> to vector<1x4x4x8xf32>
    tpu.vector_store %arg4[%c0_15, %c0_16, %c0_17, %c0_18], %26 {strides = array<i32>} : memref<1x4x4x8xf32, #tpu.memory_space<vmem>>, vector<1x4x4x8xf32>,
    return
  }
  func.func @transform_0(%arg0: i32) -> (i32, i32, i32, i32) {
    %c0_i32 = arith.constant 0 : i32
    %c0_i32_0 = arith.constant 0 : i32
    %c0_i32_1 = arith.constant 0 : i32
    %c0_i32_2 = arith.constant 0 : i32
    return %arg0, %c0_i32, %c0_i32_0, %c0_i32_1 : i32, i32, i32, i32
  }
  func.func @transform_1(%arg0: i32) -> (i32, i32, i32, i32) {
    %c0_i32 = arith.constant 0 : i32
    %c0_i32_0 = arith.constant 0 : i32
    %c0_i32_1 = arith.constant 0 : i32
    %c0_i32_2 = arith.constant 0 : i32
    return %arg0, %c0_i32, %c0_i32_0, %c0_i32_1 : i32, i32, i32, i32
  }
  func.func @transform_2(%arg0: i32) -> (i32, i32, i32, i32) {
    %c0_i32 = arith.constant 0 : i32
    %c0_i32_0 = arith.constant 0 : i32
    %c0_i32_1 = arith.constant 0 : i32
    %c0_i32_2 = arith.constant 0 : i32
    return %arg0, %c0_i32, %c0_i32_0, %c0_i32_1 : i32, i32, i32, i32
  }
  func.func @transform_3(%arg0: i32) -> (i32, i32, i32, i32) {
    %c0_i32 = arith.constant 0 : i32
    %c0_i32_0 = arith.constant 0 : i32
    %c0_i32_1 = arith.constant 0 : i32
    %c0_i32_2 = arith.constant 0 : i32
    return %arg0, %c0_i32, %c0_i32_0, %c0_i32_1 : i32, i32, i32, i32
  }
}

module attributes {stable_mosaic.version = 11 : i64} {
  func.func @_out_proj_kernel(%arg0: i32, %arg1: i32, %arg2: memref<64x32xf32, #tpu.memory_space<vmem>>, %arg3: memref<32x32xf32, #tpu.memory_space<vmem>>, %arg4: memref<1x32xf32, #tpu.memory_space<vmem>>, %arg5: memref<64x32xf32, #tpu.memory_space<vmem>>, %arg6: memref<64x32xf32, #tpu.memory_space<vmem>>) attributes {dimension_semantics = [#tpu.dimension_semantics<parallel>, #tpu.dimension_semantics<parallel>], iteration_bounds = array<i64: 1, 1>, scalar_prefetch = 0 : i64, scratch_operands = 0 : i64, tpu.core_type = #tpu.core_type<tc>, window_params = [{transform_indices = @transform_0, window_bounds = array<i64: 64, 32>}, {transform_indices = @transform_1, window_bounds = array<i64: 32, 32>}, {transform_indices = @transform_2, window_bounds = array<i64: 1, 32>}, {transform_indices = @transform_3, window_bounds = array<i64: 64, 32>}, {transform_indices = @transform_4, window_bounds = array<i64: 64, 32>}]} {
    %c0 = arith.constant 0 : index
    %c0_0 = arith.constant 0 : index
    %0 = vector.load %arg2[%c0, %c0_0] : memref<64x32xf32, #tpu.memory_space<vmem>>, vector<64x32xf32>
    %c0_1 = arith.constant 0 : index
    %c0_2 = arith.constant 0 : index
    %1 = vector.load %arg3[%c0_1, %c0_2] : memref<32x32xf32, #tpu.memory_space<vmem>>, vector<32x32xf32>
    %cst = arith.constant dense<0.000000e+00> : vector<64x32xf32>
    %2 = tpu.matmul %0, %1, %cst {dimension_numbers = #tpu.dot_dimension_numbers<[1], [0], [0], [1], [0, 0, 1, 1], [], []>} : vector<64x32xf32>, vector<32x32xf32>, vector<64x32xf32> -> vector<64x32xf32>
    %c0_3 = arith.constant 0 : index
    %c0_4 = arith.constant 0 : index
    %3 = vector.load %arg4[%c0_3, %c0_4] : memref<1x32xf32, #tpu.memory_space<vmem>>, vector<1x32xf32>
    %4 = vector.broadcast %3 : vector<1x32xf32> to vector<64x32xf32>
    %5 = arith.addf %2, %4 : vector<64x32xf32>
    %c0_5 = arith.constant 0 : index
    %c0_6 = arith.constant 0 : index
    %6 = vector.load %arg5[%c0_5, %c0_6] : memref<64x32xf32, #tpu.memory_space<vmem>>, vector<64x32xf32>
    %7 = arith.addf %5, %6 : vector<64x32xf32>
    %c0_7 = arith.constant 0 : index
    %c0_8 = arith.constant 0 : index
    %8 = vector.load %arg6[%c0_7, %c0_8] : memref<64x32xf32, #tpu.memory_space<vmem>>, vector<64x32xf32>
    tpu.vector_store %arg6[%c0_7, %c0_8], %7 {strides = array<i32>} : memref<64x32xf32, #tpu.memory_space<vmem>>, vector<64x32xf32>,
    return
  }
  func.func @transform_0(%arg0: i32, %arg1: i32) -> (i32, i32) {
    %c0_i32 = arith.constant 0 : i32
    %c0_i32_0 = arith.constant 0 : i32
    return %arg0, %c0_i32 : i32, i32
  }
  func.func @transform_1(%arg0: i32, %arg1: i32) -> (i32, i32) {
    %c0_i32 = arith.constant 0 : i32
    %c0_i32_0 = arith.constant 0 : i32
    return %c0_i32, %arg1 : i32, i32
  }
  func.func @transform_2(%arg0: i32, %arg1: i32) -> (i32, i32) {
    %c0_i32 = arith.constant 0 : i32
    %c0_i32_0 = arith.constant 0 : i32
    return %c0_i32, %arg1 : i32, i32
  }
  func.func @transform_3(%arg0: i32, %arg1: i32) -> (i32, i32) {
    %c0_i32 = arith.constant 0 : i32
    return %arg0, %arg1 : i32, i32
  }
  func.func @transform_4(%arg0: i32, %arg1: i32) -> (i32, i32) {
    %c0_i32 = arith.constant 0 : i32
    return %arg0, %arg1 : i32, i32
  }
}

module attributes {stable_mosaic.version = 11 : i64} {
  func.func @_ln_mlp_kernel(%arg0: i32, %arg1: memref<64x32xf32, #tpu.memory_space<vmem>>, %arg2: memref<1x32xf32, #tpu.memory_space<vmem>>, %arg3: memref<1x32xf32, #tpu.memory_space<vmem>>, %arg4: memref<32x128xf32, #tpu.memory_space<vmem>>, %arg5: memref<1x128xf32, #tpu.memory_space<vmem>>, %arg6: memref<128x32xf32, #tpu.memory_space<vmem>>, %arg7: memref<1x32xf32, #tpu.memory_space<vmem>>, %arg8: memref<64x32xf32, #tpu.memory_space<vmem>>) attributes {dimension_semantics = [#tpu.dimension_semantics<parallel>], iteration_bounds = array<i64: 1>, scalar_prefetch = 0 : i64, scratch_operands = 0 : i64, tpu.core_type = #tpu.core_type<tc>, window_params = [{transform_indices = @transform_0, window_bounds = array<i64: 64, 32>}, {pipeline_mode = #tpu.pipeline_mode<synchronous>, transform_indices = @transform_1, window_bounds = array<i64: 1, 32>}, {pipeline_mode = #tpu.pipeline_mode<synchronous>, transform_indices = @transform_2, window_bounds = array<i64: 1, 32>}, {pipeline_mode = #tpu.pipeline_mode<synchronous>, transform_indices = @transform_3, window_bounds = array<i64: 32, 128>}, {pipeline_mode = #tpu.pipeline_mode<synchronous>, transform_indices = @transform_4, window_bounds = array<i64: 1, 128>}, {pipeline_mode = #tpu.pipeline_mode<synchronous>, transform_indices = @transform_5, window_bounds = array<i64: 128, 32>}, {pipeline_mode = #tpu.pipeline_mode<synchronous>, transform_indices = @transform_6, window_bounds = array<i64: 1, 32>}, {transform_indices = @transform_7, window_bounds = array<i64: 64, 32>}]} {
    %c0 = arith.constant 0 : index
    %c0_0 = arith.constant 0 : index
    %0 = vector.load %arg1[%c0, %c0_0] : memref<64x32xf32, #tpu.memory_space<vmem>>, vector<64x32xf32>
    %cst = arith.constant dense<0.000000e+00> : vector<64xf32>
    %1 = vector.multi_reduction <add>, %0, %cst [1] : vector<64x32xf32> to vector<64xf32>
    %2 = vector.shape_cast %1 : vector<64xf32> to vector<64x1xf32>
    %cst_1 = arith.constant 3.200000e+01 : f32
    %3 = vector.broadcast %cst_1 : f32 to vector<64x1xf32>
    %4 = arith.divf %2, %3 : vector<64x1xf32>
    %5 = vector.broadcast %4 : vector<64x1xf32> to vector<64x32xf32>
    %6 = arith.subf %0, %5 : vector<64x32xf32>
    %7 = arith.mulf %6, %6 : vector<64x32xf32>
    %cst_2 = arith.constant dense<0.000000e+00> : vector<64xf32>
    %8 = vector.multi_reduction <add>, %7, %cst_2 [1] : vector<64x32xf32> to vector<64xf32>
    %9 = vector.shape_cast %8 : vector<64xf32> to vector<64x1xf32>
    %cst_3 = arith.constant 3.200000e+01 : f32
    %10 = vector.broadcast %cst_3 : f32 to vector<64x1xf32>
    %11 = arith.divf %9, %10 : vector<64x1xf32>
    %cst_4 = arith.constant 9.99999974E-6 : f32
    %12 = vector.broadcast %cst_4 : f32 to vector<64x1xf32>
    %13 = arith.addf %11, %12 : vector<64x1xf32>
    %14 = math.rsqrt %13 : vector<64x1xf32>
    %15 = vector.broadcast %14 : vector<64x1xf32> to vector<64x32xf32>
    %16 = arith.mulf %6, %15 : vector<64x32xf32>
    %c0_5 = arith.constant 0 : index
    %c0_6 = arith.constant 0 : index
    %17 = vector.load %arg2[%c0_5, %c0_6] : memref<1x32xf32, #tpu.memory_space<vmem>>, vector<1x32xf32>
    %18 = vector.broadcast %17 : vector<1x32xf32> to vector<64x32xf32>
    %19 = arith.mulf %16, %18 : vector<64x32xf32>
    %c0_7 = arith.constant 0 : index
    %c0_8 = arith.constant 0 : index
    %20 = vector.load %arg3[%c0_7, %c0_8] : memref<1x32xf32, #tpu.memory_space<vmem>>, vector<1x32xf32>
    %21 = vector.broadcast %20 : vector<1x32xf32> to vector<64x32xf32>
    %22 = arith.addf %19, %21 : vector<64x32xf32>
    %c0_9 = arith.constant 0 : index
    %c0_10 = arith.constant 0 : index
    %23 = vector.load %arg4[%c0_9, %c0_10] : memref<32x128xf32, #tpu.memory_space<vmem>>, vector<32x128xf32>
    %cst_11 = arith.constant dense<0.000000e+00> : vector<64x128xf32>
    %24 = tpu.matmul %22, %23, %cst_11 {dimension_numbers = #tpu.dot_dimension_numbers<[1], [0], [0], [1], [0, 0, 1, 1], [], []>} : vector<64x32xf32>, vector<32x128xf32>, vector<64x128xf32> -> vector<64x128xf32>
    %c0_12 = arith.constant 0 : index
    %c0_13 = arith.constant 0 : index
    %25 = vector.load %arg5[%c0_12, %c0_13] : memref<1x128xf32, #tpu.memory_space<vmem>>, vector<1x128xf32>
    %26 = vector.broadcast %25 : vector<1x128xf32> to vector<64x128xf32>
    %27 = arith.addf %24, %26 : vector<64x128xf32>
    %28 = arith.mulf %27, %27 : vector<64x128xf32>
    %29 = arith.mulf %27, %28 : vector<64x128xf32>
    %cst_14 = arith.constant 4.471500e-02 : f32
    %30 = vector.broadcast %cst_14 : f32 to vector<64x128xf32>
    %31 = arith.mulf %30, %29 : vector<64x128xf32>
    %32 = arith.addf %27, %31 : vector<64x128xf32>
    %cst_15 = arith.constant 0.797884583 : f32
    %33 = vector.broadcast %cst_15 : f32 to vector<64x128xf32>
    %34 = arith.mulf %33, %32 : vector<64x128xf32>
    %35 = math.tanh %34 : vector<64x128xf32>
    %cst_16 = arith.constant 1.000000e+00 : f32
    %36 = vector.broadcast %cst_16 : f32 to vector<64x128xf32>
    %37 = arith.addf %36, %35 : vector<64x128xf32>
    %cst_17 = arith.constant 5.000000e-01 : f32
    %38 = vector.broadcast %cst_17 : f32 to vector<64x128xf32>
    %39 = arith.mulf %38, %37 : vector<64x128xf32>
    %40 = arith.mulf %27, %39 : vector<64x128xf32>
    %c0_18 = arith.constant 0 : index
    %c0_19 = arith.constant 0 : index
    %41 = vector.load %arg6[%c0_18, %c0_19] : memref<128x32xf32, #tpu.memory_space<vmem>>, vector<128x32xf32>
    %cst_20 = arith.constant dense<0.000000e+00> : vector<64x32xf32>
    %42 = tpu.matmul %40, %41, %cst_20 {dimension_numbers = #tpu.dot_dimension_numbers<[1], [0], [0], [1], [0, 0, 1, 1], [], []>} : vector<64x128xf32>, vector<128x32xf32>, vector<64x32xf32> -> vector<64x32xf32>
    %c0_21 = arith.constant 0 : index
    %c0_22 = arith.constant 0 : index
    %43 = vector.load %arg7[%c0_21, %c0_22] : memref<1x32xf32, #tpu.memory_space<vmem>>, vector<1x32xf32>
    %44 = vector.broadcast %43 : vector<1x32xf32> to vector<64x32xf32>
    %45 = arith.addf %42, %44 : vector<64x32xf32>
    %46 = arith.addf %45, %0 : vector<64x32xf32>
    %c0_23 = arith.constant 0 : index
    %c0_24 = arith.constant 0 : index
    %47 = vector.load %arg8[%c0_23, %c0_24] : memref<64x32xf32, #tpu.memory_space<vmem>>, vector<64x32xf32>
    tpu.vector_store %arg8[%c0_23, %c0_24], %46 {strides = array<i32>} : memref<64x32xf32, #tpu.memory_space<vmem>>, vector<64x32xf32>,
    return
  }
  func.func @transform_0(%arg0: i32) -> (i32, i32) {
    %c0_i32 = arith.constant 0 : i32
    %c0_i32_0 = arith.constant 0 : i32
    return %arg0, %c0_i32 : i32, i32
  }
  func.func @transform_1(%arg0: i32) -> (i32, i32) {
    %c0_i32 = arith.constant 0 : i32
    %c0_i32_0 = arith.constant 0 : i32
    %c0_i32_1 = arith.constant 0 : i32
    return %c0_i32, %c0_i32_0 : i32, i32
  }
  func.func @transform_2(%arg0: i32) -> (i32, i32) {
    %c0_i32 = arith.constant 0 : i32
    %c0_i32_0 = arith.constant 0 : i32
    %c0_i32_1 = arith.constant 0 : i32
    return %c0_i32, %c0_i32_0 : i32, i32
  }
  func.func @transform_3(%arg0: i32) -> (i32, i32) {
    %c0_i32 = arith.constant 0 : i32
    %c0_i32_0 = arith.constant 0 : i32
    %c0_i32_1 = arith.constant 0 : i32
    return %c0_i32, %c0_i32_0 : i32, i32
  }
  func.func @transform_4(%arg0: i32) -> (i32, i32) {
    %c0_i32 = arith.constant 0 : i32
    %c0_i32_0 = arith.constant 0 : i32
    %c0_i32_1 = arith.constant 0 : i32
    return %c0_i32, %c0_i32_0 : i32, i32
  }
  func.func @transform_5(%arg0: i32) -> (i32, i32) {
    %c0_i32 = arith.constant 0 : i32
    %c0_i32_0 = arith.constant 0 : i32
    %c0_i32_1 = arith.constant 0 : i32
    return %c0_i32, %c0_i32_0 : i32, i32
  }
  func.func @transform_6(%arg0: i32) -> (i32, i32) {
    %c0_i32 = arith.constant 0 : i32
    %c0_i32_0 = arith.constant 0 : i32
    %c0_i32_1 = arith.constant 0 : i32
    return %c0_i32, %c0_i32_0 : i32, i32
  }
  func.func @transform_7(%arg0: i32) -> (i32, i32) {
    %c0_i32 = arith.constant 0 : i32
    %c0_i32_0 = arith.constant 0 : i32
    return %arg0, %c0_i32 : i32, i32
  }
}

</mosaic_0001>

<bundles_post_ra>
// kernel: structured_transformer_block.8
= control target key start
LH: loop header
LB: loop body
LE: loop exit
PB: predicated region body
PF: predicated region fallthrough
CT: control target
= control target key end

     0   :  { %vm19_vm0 = vcmask 261120   ;;  %vm150_vm1 = vcmask 785408   ;;  %s251_s0 = inlined_call_operand.vmem [shape: f32[16,32], index: 0, kind: input, shape index: {}]   ;;  %s252_s3 = inlined_call_operand.vmem [shape: f32[32,96], index: 3, kind: input, shape index: {}]   ;;  %s253_s1 = inlined_call_operand.vmem [shape: f32[1,32], index: 1, kind: input, shape index: {}]   ;;  %s254_s2 = inlined_call_operand.vmem [shape: f32[1,32], index: 2, kind: input, shape index: {}]   ;;  %s255_s4 = inlined_call_operand.vmem [shape: f32[16,96], index: 4, kind: output, shape index: {}]  }
   0x1   :  { %v17_v0 = vld [vmem:[%s251_s0] sm:$0xff]  ;;  %v18_v1 = vld [vmem:[%s251_s0 + $0x8] sm:$0xff]  ;;  %v67_v16 = vld [vmem:[%s252_s3 + $0x10] sm:$0xff] }
   0x2   :  { %v20_v2 = vsel %vm19_vm0, %v17_v0, 0.0  ;;  %v23_v3 = vsel %vm19_vm0, %v18_v1, 0.0  ;;  %v65_v14 = vld [vmem:[%s252_s3] sm:$0xff]  ;;  %v66_v15 = vld [vmem:[%s252_s3 + $0x8] sm:$0xff]  ;;  %v68_v18 = vld [vmem:[%s252_s3 + $0x18] sm:$0xff] }
   0x3   :  { %21 = vadd.xlane.f32.xlu0 %v20_v2  ;;  %v178_v17 = vpack.c.bf16 %v66_v15, %v65_v14  ;;  %v182_v19 = vpack.c.bf16 %v68_v18, %v67_v16  ;;  %v157_v27 = vld [vmem:[%s253_s1] ss:$0 sm:$0xff] }
   0x4   :  { %v158_v29 = vld [vmem:[%s254_s2] ss:$0 sm:$0xff] }
   0x5   :  { %179 = vmatprep.subr.bf16.mxu0 %v178_v17 }
   0x6   :  { %181 = vmatpush3.bf16.msra.mxu0 %v178_v17 }
   0x7   :  { %24 = vadd.xlane.f32.xlu0 %v23_v3  ;;  %183 = vmatprep.subr.bf16.mxu0 %v182_v19 }
   0xa   :  { %185 = vmatpush3.bf16.msra.mxu0 %v182_v19 }
  0x90   :  { %v22_v4 = vpop.xlane.xlu0 %21 }
  0x91   :  { %v27_v5 = vmul.f32 0.03125, %v22_v4 }
  0x93   :  { %v29_v6 = vsub.f32 %v17_v0, %v27_v5 }
  0x94   :  { %v25_v7 = vpop.xlane.xlu0 %24 }
  0x95   :  { %v28_v8 = vmul.f32 0.03125, %v25_v7  ;;  %v31_v9 = vmul.f32 %v29_v6, %v29_v6 }
  0x97   :  { %v30_v10 = vsub.f32 %v18_v1, %v28_v8  ;;  %v33_v11 = vsel %vm19_vm0, %v31_v9, 0.0 }
  0x98   :  { %34 = vadd.xlane.f32.xlu1 %v33_v11 }
  0x99   :  { %v32_v12 = vmul.f32 %v30_v10, %v30_v10 }
  0x9b   :  { %v36_v13 = vsel %vm19_vm0, %v32_v12, 0.0 }
  0x9c   :  { %37 = vadd.xlane.f32.xlu1 %v36_v13 }
 0x125   :  { %v35_v20 = vpop.xlane.xlu1 %34 }
 0x126   :  { %v39_v21 = vmul.f32 0.03125, %v35_v20 }
 0x128   :  { %v41_v22 = vadd.f32 1e-05, %v39_v21 }
 0x129   :  { %v38_v23 = vpop.xlane.xlu1 %37 }
 0x12a   :  { %186 = vrsqrt.f32 %v41_v22  ;;  %v40_v24 = vmul.f32 0.03125, %v38_v23 }
 0x12c   :  { %v42_v25 = vadd.f32 1e-05, %v40_v24 }
 0x12e   :  { %188 = vrsqrt.f32 %v42_v25 }
 0x134   :  { %v187_v26 = vpop.eup %186 }
 0x135   :  { %v45_v28 = vmul.f32 %v187_v26, %v29_v6 }
 0x137   :  { %v54_v30 = vmul.f32 %v157_v27, %v45_v28 }
 0x138   :  { %v189_v31 = vpop.eup %188 }
 0x139   :  { %v46_v32 = vmul.f32 %v189_v31, %v30_v10  ;;  %v63_v33 = vadd.f32 %v158_v29, %v54_v30 }
 0x13b   :  { %v55_v34 = vmul.f32 %v157_v27, %v46_v32  ;;  %175 = vmatprep.mubr.msk.f32.mxu0 %vm19_vm0, %v63_v33 }
 0x13d   :  { %v64_v35 = vadd.f32 %v158_v29, %v55_v34 }
 0x13f   :  { %176 = vmatmul.mubr.msk.f32.vlgmr.msra.gmra.mrb[0].mxu0 %vm19_vm0, %v64_v35 }
 0x212   :  { %v177_v36 = vpop.f32.mrb[0].mxu0 }
 0x213   :  { %152 = vst.msk [vmem:[%s255_s4 + $0x8] sm:$0xff] %vm150_vm1, %v177_v36  ;;  %v141_v37 = vpop.f32.mrb[1].mxu0 }
 0x214   :  { %151 = vst.msk [vmem:[%s255_s4] sm:$0xff] %vm150_vm1, %v141_v37 }

// kernel: structured_transformer_block.10
= control target key start
LH: loop header
LB: loop body
LE: loop exit
PB: predicated region body
PF: predicated region fallthrough
CT: control target
= control target key end

     0   :  { %vm30_vm0 = vcmask 261120   ;;  %s212_s1 = inlined_call_operand.vmem [shape: f32[32,32], index: 1, kind: input, shape index: {}]   ;;  %s213_s0 = inlined_call_operand.vmem [shape: f32[16,32], index: 0, kind: input, shape index: {}]   ;;  %s214_s2 = inlined_call_operand.vmem [shape: f32[1,32], index: 2, kind: input, shape index: {}]   ;;  %s215_s3 = inlined_call_operand.vmem [shape: f32[16,32], index: 3, kind: input, shape index: {}]   ;;  %s216_s4 = inlined_call_operand.vmem [shape: f32[16,32], index: 4, kind: output, shape index: {}]  }
   0x1   :  { %v19_v0 = vld [vmem:[%s212_s1] sm:$0xff]  ;;  %v20_v1 = vld [vmem:[%s212_s1 + $0x8] sm:$0xff]  ;;  %v21_v2 = vld [vmem:[%s212_s1 + $0x10] sm:$0xff] }
   0x2   :  { %v142_v3 = vpack.c.bf16 %v20_v1, %v19_v0  ;;  %v22_v4 = vld [vmem:[%s212_s1 + $0x18] sm:$0xff]  ;;  %v17_v5 = vld [vmem:[%s213_s0] sm:$0xff]  ;;  %v18_v7 = vld [vmem:[%s213_s0 + $0x8] sm:$0xff] }
   0x3   :  { %v146_v6 = vpack.c.bf16 %v22_v4, %v21_v2  ;;  %139 = vmatprep.mubr.msk.f32.mxu0 %vm30_vm0, %v17_v5  ;;  %v122_v8 = vld [vmem:[%s214_s2] ss:$0 sm:$0xff]  ;;  %v113_v10 = vld [vmem:[%s215_s3 + $0x8] sm:$0xff] }
   0x4   :  { %143 = vmatprep.subr.bf16.mxu0 %v142_v3  ;;  %v112_v13 = vld [vmem:[%s215_s3] sm:$0xff] }
   0x5   :  { %145 = vmatpush3.bf16.msra.mxu0 %v142_v3 }
   0x6   :  { %147 = vmatprep.subr.bf16.mxu0 %v146_v6 }
   0x9   :  { %149 = vmatpush3.bf16.msra.mxu0 %v146_v6 }
   0xc   :  { %140 = vmatmul.mubr.msk.f32.vlgmr.msra.gmra.mrb[0].mxu0 %vm30_vm0, %v18_v7 }
  0xdf   :  { %v141_v9 = vpop.f32.mrb[0].mxu0 }
  0xe0   :  { %v109_v11 = vadd.f32 %v141_v9, %v122_v8  ;;  %v103_v12 = vpop.f32.mrb[1].mxu0 }
  0xe1   :  { %v104_v14 = vadd.f32 %v122_v8, %v103_v12 }
  0xe2   :  { %v115_v15 = vadd.f32 %v113_v10, %v109_v11 }
  0xe3   :  { %v114_v16 = vadd.f32 %v112_v13, %v104_v14 }
  0xe4   :  { %117 = vst.msk [vmem:[%s216_s4 + $0x8] sm:$0xff] %vm30_vm0, %v115_v15 }
  0xe5   :  { %116 = vst.msk [vmem:[%s216_s4] sm:$0xff] %vm30_vm0, %v114_v16 }

// kernel: structured_transformer_block.11
= control target key start
LH: loop header
LB: loop body
LE: loop exit
PB: predicated region body
PF: predicated region fallthrough
CT: control target
= control target key end

     0   :  { %vm28_vm0 = vcmask 261120   ;;  %s556_s0 = inlined_call_operand.vmem [shape: f32[16,32], index: 0, kind: input, shape index: {}]   ;;  %s557_s3 = inlined_call_operand.vmem [shape: f32[32,128], index: 3, kind: input, shape index: {}]   ;;  %s558_s1 = inlined_call_operand.vmem [shape: f32[1,32], index: 1, kind: input, shape index: {}]   ;;  %s559_s2 = inlined_call_operand.vmem [shape: f32[1,32], index: 2, kind: input, shape index: {}]   ;;  %s560_s5 = inlined_call_operand.vmem [shape: f32[128,32], index: 5, kind: input, shape index: {}]   ;;  %s561_s4 = inlined_call_operand.vmem [shape: f32[1,128], index: 4, kind: input, shape index: {}]   ;;  %s562_s6 = inlined_call_operand.vmem [shape: f32[1,32], index: 6, kind: input, shape index: {}]   ;;  %s563_s7 = inlined_call_operand.vmem [shape: f32[16,32], index: 7, kind: output, shape index: {}]  }
   0x1   :  { %v457_v0 = vld [vmem:[%s556_s0] sm:$0xff]  ;;  %v462_v1 = vld [vmem:[%s556_s0 + $0x8] sm:$0xff]  ;;  %v76_v16 = vld [vmem:[%s557_s3 + $0x10] sm:$0xff] }
   0x2   :  { %v29_v2 = vsel %vm28_vm0, %v457_v0, 0.0  ;;  %v32_v3 = vsel %vm28_vm0, %v462_v1, 0.0  ;;  %v74_v14 = vld [vmem:[%s557_s3] sm:$0xff]  ;;  %v75_v15 = vld [vmem:[%s557_s3 + $0x8] sm:$0xff]  ;;  %v77_v18 = vld [vmem:[%s557_s3 + $0x18] sm:$0xff] }
   0x3   :  { %30 = vadd.xlane.f32.xlu0 %v29_v2  ;;  %v366_v17 = vpack.c.bf16 %v75_v15, %v74_v14  ;;  %v370_v19 = vpack.c.bf16 %v77_v18, %v76_v16  ;;  %v290_v27 = vld [vmem:[%s558_s1] ss:$0 sm:$0xff]  ;;  %v185_v37 = vld [vmem:[%s560_s5 + $0x8] sm:$0xff]  ;;  %v186_v39 = vld [vmem:[%s560_s5 + $0x10] sm:$0xff] }
   0x4   :  { %v291_v29 = vld [vmem:[%s559_s2] ss:$0 sm:$0xff]  ;;  %v187_v40 = vld [vmem:[%s560_s5 + $0x18] sm:$0xff]  ;;  %v189_v43 = vld [vmem:[%s560_s5 + $0x28] sm:$0xff] }
   0x5   :  { %367 = vmatprep.subr.bf16.mxu0 %v366_v17  ;;  %v184_v36 = vld [vmem:[%s560_s5] sm:$0xff]  ;;  %v378_v41 = vpack.c.bf16 %v187_v40, %v186_v39  ;;  %v190_v45 = vld [vmem:[%s560_s5 + $0x30] sm:$0xff]  ;;  %v191_v46 = vld [vmem:[%s560_s5 + $0x38] sm:$0xff] }
   0x6   :  { %369 = vmatpush3.bf16.msra.mxu0 %v366_v17  ;;  %v374_v38 = vpack.c.bf16 %v185_v37, %v184_v36  ;;  %v188_v42 = vld [vmem:[%s560_s5 + $0x20] sm:$0xff]  ;;  %v386_v47 = vpack.c.bf16 %v191_v46, %v190_v45  ;;  %v193_v49 = vld [vmem:[%s560_s5 + $0x48] sm:$0xff]  ;;  %v194_v50 = vld [vmem:[%s560_s5 + $0x50] sm:$0xff] }
   0x7   :  { %33 = vadd.xlane.f32.xlu0 %v32_v3  ;;  %371 = vmatprep.subr.bf16.mxu0 %v370_v19  ;;  %v382_v44 = vpack.c.bf16 %v189_v43, %v188_v42  ;;  %v192_v48 = vld [vmem:[%s560_s5 + $0x40] sm:$0xff]  ;;  %v195_v52 = vld [vmem:[%s560_s5 + $0x58] sm:$0xff]  ;;  %v197_v55 = vld [vmem:[%s560_s5 + $0x68] sm:$0xff] }
   0x8   :  { %375 = vmatprep.subr.bf16.mxu1 %v374_v38  ;;  %v390_v51 = vpack.c.bf16 %v193_v49, %v192_v48  ;;  %v394_v53 = vpack.c.bf16 %v195_v52, %v194_v50  ;;  %v196_v54 = vld [vmem:[%s560_s5 + $0x60] sm:$0xff]  ;;  %v198_v57 = vld [vmem:[%s560_s5 + $0x70] sm:$0xff]  ;;  %v199_v58 = vld [vmem:[%s560_s5 + $0x78] sm:$0xff] }
   0x9   :  { %377 = vmatpush3.bf16.msra.mxu1 %v374_v38  ;;  %v398_v56 = vpack.c.bf16 %v197_v55, %v196_v54  ;;  %v402_v59 = vpack.c.bf16 %v199_v58, %v198_v57  ;;  %v292_v60 = vld [vmem:[%s561_s4] ss:$0 sm:$0xff] }
   0xa   :  { %373 = vmatpush3.bf16.msra.mxu0 %v370_v19  ;;  %379 = vmatprep.subr.bf16.mxu1 %v378_v41 }
   0xd   :  { %381 = vmatpush3.bf16.msra.mxu1 %v378_v41 }
   0xe   :  { %383 = vmatprep.subr.bf16.mxu1 %v382_v44 }
  0x11   :  { %385 = vmatpush3.bf16.msra.mxu1 %v382_v44 }
  0x12   :  { %387 = vmatprep.subr.bf16.mxu1 %v386_v47 }
  0x15   :  { %389 = vmatpush3.bf16.msra.mxu1 %v386_v47 }
  0x16   :  { %391 = vmatprep.subr.bf16.mxu1 %v390_v51 }
  0x19   :  { %393 = vmatpush3.bf16.msra.mxu1 %v390_v51 }
  0x1a   :  { %395 = vmatprep.subr.bf16.mxu1 %v394_v53 }
  0x1d   :  { %397 = vmatpush3.bf16.msra.mxu1 %v394_v53 }
  0x1e   :  { %399 = vmatprep.subr.bf16.mxu1 %v398_v56 }
  0x21   :  { %401 = vmatpush3.bf16.msra.mxu1 %v398_v56 }
  0x22   :  { %403 = vmatprep.subr.bf16.mxu1 %v402_v59 }
  0x25   :  { %405 = vmatpush3.bf16.msra.mxu1 %v402_v59 }
  0x90   :  { %v31_v4 = vpop.xlane.xlu0 %30 }
  0x91   :  { %v36_v5 = vmul.f32 0.03125, %v31_v4 }
  0x93   :  { %v38_v6 = vsub.f32 %v457_v0, %v36_v5 }
  0x94   :  { %v34_v7 = vpop.xlane.xlu0 %33 }
  0x95   :  { %v37_v8 = vmul.f32 0.03125, %v34_v7  ;;  %v40_v9 = vmul.f32 %v38_v6, %v38_v6 }
  0x97   :  { %v39_v10 = vsub.f32 %v462_v1, %v37_v8  ;;  %v42_v11 = vsel %vm28_vm0, %v40_v9, 0.0 }
  0x98   :  { %43 = vadd.xlane.f32.xlu1 %v42_v11 }
  0x99   :  { %v41_v12 = vmul.f32 %v39_v10, %v39_v10 }
  0x9b   :  { %v45_v13 = vsel %vm28_vm0, %v41_v12, 0.0 }
  0x9c   :  { %46 = vadd.xlane.f32.xlu1 %v45_v13 }
 0x125   :  { %v44_v20 = vpop.xlane.xlu1 %43 }
 0x126   :  { %v48_v21 = vmul.f32 0.03125, %v44_v20 }
 0x128   :  { %v50_v22 = vadd.f32 1e-05, %v48_v21  ;;  %v295_v21 = vld [vmem:[%s562_s6] ss:$0 sm:$0xff] }
 0x129   :  { %v47_v23 = vpop.xlane.xlu1 %46 }
 0x12a   :  { %406 = vrsqrt.f32 %v50_v22  ;;  %v49_v24 = vmul.f32 0.03125, %v47_v23 }
 0x12c   :  { %v51_v25 = vadd.f32 1e-05, %v49_v24 }
 0x12e   :  { %408 = vrsqrt.f32 %v51_v25 }
 0x134   :  { %v407_v26 = vpop.eup %406 }
 0x135   :  { %v54_v28 = vmul.f32 %v407_v26, %v38_v6 }
 0x137   :  { %v63_v30 = vmul.f32 %v290_v27, %v54_v28 }
 0x138   :  { %v409_v31 = vpop.eup %408 }
 0x139   :  { %v55_v32 = vmul.f32 %v409_v31, %v39_v10  ;;  %v72_v33 = vadd.f32 %v291_v29, %v63_v30 }
 0x13b   :  { %v64_v34 = vmul.f32 %v290_v27, %v55_v32  ;;  %328 = vmatprep.mubr.msk.f32.mxu0 %vm28_vm0, %v72_v33 }
 0x13d   :  { %v73_v35 = vadd.f32 %v291_v29, %v64_v34 }
 0x13f   :  { %329 = vmatmul.mubr.msk.f32.vlgmr.msra.gmra.mrb[0].mxu0 %vm28_vm0, %v73_v35 }
 0x212   :  { %v330_v61 = vpop.f32.mrb[0].mxu0 }
 0x213   :  { %v163_v62 = vadd.f32 %v330_v61, %v292_v60  ;;  %v157_v63 = vpop.f32.mrb[1].mxu0 }
 0x214   :  { %v158_v2 = vadd.f32 %v292_v60, %v157_v63 }
 0x215   :  { %v167_v3 = vmul.f32 %v163_v62, %v163_v62 }
 0x216   :  { %v166_v4 = vmul.f32 %v158_v2, %v158_v2 }
 0x217   :  { %v169_v5 = vmul.f32 %v167_v3, %v163_v62 }
 0x218   :  { %v168_v6 = vmul.f32 %v166_v4, %v158_v2 }
 0x219   :  { %v171_v7 = vmul.f32 0.044715, %v169_v5 }
 0x21a   :  { %v170_v8 = vmul.f32 0.044715, %v168_v6 }
 0x21b   :  { %v173_v9 = vadd.f32 %v171_v7, %v163_v62 }
 0x21c   :  { %v172_v10 = vadd.f32 %v170_v8, %v158_v2 }
 0x21d   :  { %v175_v11 = vmul.f32 0.7978846, %v173_v9 }
 0x21e   :  { %v174_v12 = vmul.f32 0.7978846, %v172_v10 }
 0x21f   :  { %410 = vtanh.f32 %v175_v11 }
 0x220   :  { %412 = vtanh.f32 %v174_v12 }
 0x229   :  { %v411_v13 = vpop.eup %410 }
 0x22a   :  { %v413_v14 = vpop.eup %412  ;;  %v179_v15 = vadd.f32 1.0, %v411_v13 }
 0x22b   :  { %v178_v16 = vadd.f32 1.0, %v413_v14 }
 0x22c   :  { %v181_v17 = vmul.f32 0.5, %v179_v15 }
 0x22d   :  { %v180_v18 = vmul.f32 0.5, %v178_v16 }
 0x22e   :  { %v183_v20 = vmul.f32 %v181_v17, %v163_v62 }
 0x22f   :  { %v182_v19 = vmul.f32 %v180_v18, %v158_v2 }
 0x231   :  { %363 = vmatprep.mubr.f32.mxu1 %v182_v19 }
 0x232   :  { %364 = vmatmul.mubr.f32.vlgmr.msra.gmra.mrb[0].mxu1 %v183_v20 }
 0x305   :  { %v365_v22 = vpop.f32.mrb[0].mxu1 }
 0x306   :  { %v279_v23 = vadd.f32 %v365_v22, %v295_v21  ;;  %v273_v24 = vpop.f32.mrb[1].mxu1 }
 0x307   :  { %v274_v25 = vadd.f32 %v295_v21, %v273_v24 }
 0x308   :  { %v283_v26 = vadd.f32 %v279_v23, %v462_v1 }
 0x309   :  { %v282_v27 = vadd.f32 %v274_v25, %v457_v0 }
 0x30a   :  { %285 = vst.msk [vmem:[%s563_s7 + $0x8] sm:$0xff] %vm28_vm0, %v283_v26 }
 0x30b   :  { %284 = vst.msk [vmem:[%s563_s7] sm:$0xff] %vm28_vm0, %v282_v27 }

// kernel: structured_transformer_block.9
= control target key start
LH: loop header
LB: loop body
LE: loop exit
PB: predicated region body
PF: predicated region fallthrough
CT: control target
= control target key end

     0   :  { %s1103_s12 = smov 0   ;;  %s1180_s0 = inlined_call_operand.vmem [shape: f32[2,4,8,8], index: 0, kind: input, shape index: {}]   ;;  %s1181_s1 = inlined_call_operand.vmem [shape: f32[2,4,8,8], index: 1, kind: input, shape index: {}]   ;;  %s1182_s2 = inlined_call_operand.vmem [shape: f32[2,4,8,8], index: 2, kind: input, shape index: {}]   ;;  %s1183_s3 = inlined_call_operand.vmem [shape: f32[2,4,8,8], index: 3, kind: output, shape index: {}]  }
   0x1 LB: > { %s959_s13 = sadd.s32 4294967295, %s1079_s12   ;;  %p963_p0 = scmp.ge.s32.totalorder %s1079_s12, 1  ;;  %s1079_s12 = sphi %s1103_s12, %s13_s12  }
   0x2   : > { %p157_p1 = scmp.lt.s32.totalorder %s1079_s12, 3 }
   0x4   : > { %p158_p2 = pnand %p963_p0, %p157_p1 }
   0x5   : > { %p191_p3 = scmp.lt.s32.totalorder (!%p158_p2), %s959_s13, 1  ;;  %v1081_v0 = vmov (!%p158_p2), 0.0   ;;  %vm1082_vm0 = vmmov (!%p158_p2), 0   ;;  %vm223_vm1 = vcmask (!%p158_p2), 64512   ;;  %v528_v9 = vlaneseq (!%p158_p2) }
   0x6   : > { %161 = sbr.rel (%p158_p2) target bundleno = 768 (0x300), region = 32  ;;  %1007 = vmatprep.subr.mxu0 (!%p158_p2), %v1081_v0  ;;  %1009 = vmatprep.mubr.msk.f32.mxu0 (!%p158_p2), %vm1082_vm0, %v1081_v0 }
   0x7   : > { %1012 = vmatprep.subr.mxu1 (!%p158_p2), %v1081_v0  ;;  %1014 = vmatprep.mubr.msk.f32.mxu1 (!%p158_p2), %vm1082_vm0, %v1081_v0  ;;  %v529_v10 = vshrl.u32 (!%p158_p2), %v528_v9, 7  ;;  %v531_v11 = vand.u32 (!%p158_p2), 127, %v528_v9 }
   0x9   : > { %v980_v12 = vadd.s32 (!%p158_p2), 4294967292, %v529_v10  ;;  %vm532_vm2 = vcmp.le.s32.totalorder (!%p158_p2), %v531_v11, %v529_v10 }
   0xb   : > { %vm534_vm3 = vcmp.gt.s32.totalorder (!%p158_p2), %v531_v11, %v980_v12 }
   0xc   : > { %vm535_vm4 = vmand (!%p158_p2), %vm532_vm2, %vm534_vm3 }
   0xd   : > { %s1185_s13 = smov (!%p191_p3, %s959_s13), 1 }
   0xe   : > { %s1117_s14 = sshll.u32 %s1185_s13, 5 }
   0xf   : > { %s200_s17 = scalar_lea.vmem %s1181_s1, %s1117_s14  ;;  %s195_s20 = scalar_lea.vmem %s1180_s0, %s1117_s14 }
  0x10   : > { %v215_v1 = vld [vmem:[%s200_s17] sm:$0xff]  ;;  %v216_v2 = vld [vmem:[%s200_s17 + $0x8] sm:$0xff]  ;;  %v217_v5 = vld [vmem:[%s200_s17 + $0x10] sm:$0xff]  ;;  %s205_s23 = scalar_lea.vmem %s1182_s2, %s1117_s14  ;;  %s210_s26 = scalar_lea.vmem %s1183_s3, %s1117_s14 }
  0x11   : > { %1008 = vmatpush3.xpose.msk.msra.mxu0 %vm223_vm1, %v215_v1  ;;  %v211_v3 = vld [vmem:[%s195_s20] sm:$0xff]  ;;  %1013 = vmatpush3.xpose.msk.msra.mxu1 %vm223_vm1, %v216_v2  ;;  %v212_v4 = vld [vmem:[%s195_s20 + $0x8] sm:$0xff]  ;;  %v218_v6 = vld [vmem:[%s200_s17 + $0x18] sm:$0xff] }
  0x12   : > { %1017 = vmatprep.subr.mxu0 %v1081_v0  ;;  %1022 = vmatprep.subr.mxu1 %v1081_v0  ;;  %v213_v7 = vld [vmem:[%s195_s20 + $0x10] sm:$0xff]  ;;  %v214_v8 = vld [vmem:[%s195_s20 + $0x18] sm:$0xff]  ;;  %v219_v49 = vld [vmem:[%s205_s23] sm:$0xff] }
  0x13   : > { %v220_v50 = vld [vmem:[%s205_s23 + $0x8] sm:$0xff]  ;;  %v221_v57 = vld [vmem:[%s205_s23 + $0x10] sm:$0xff]  ;;  %v222_v61 = vld [vmem:[%s205_s23 + $0x18] sm:$0xff] }
  0x14   : > { %1010 = vmatmul.mubr.msk.f32.vlgmr.msra.gmra.mrb[0].mxu0 %vm223_vm1, %v211_v3  ;;  %1015 = vmatmul.mubr.msk.f32.vlgmr.msra.gmra.mrb[0].mxu1 %vm223_vm1, %v212_v4 }
  0x15   : > { %1018 = vmatpush3.xpose.msk.msra.mxu0 %vm223_vm1, %v217_v5  ;;  %1019 = vmatprep.mubr.msk.f32.mxu0 %vm1082_vm0, %v1081_v0 }
  0x16   : > { %1023 = vmatpush3.xpose.msk.msra.mxu1 %vm223_vm1, %v218_v6  ;;  %1024 = vmatprep.mubr.msk.f32.mxu1 %vm1082_vm0, %v1081_v0 }
  0x17   : > { %1027 = vmatprep.subr.mxu0 %v1081_v0  ;;  %1032 = vmatprep.subr.mxu1 %v1081_v0 }
  0x18   : > { %1020 = vmatmul.mubr.msk.f32.vlgmr.msra.gmra.mrb[2].mxu0 %vm223_vm1, %v213_v7 }
  0x19   : > { %1025 = vmatmul.mubr.msk.f32.vlgmr.msra.gmra.mrb[2].mxu1 %vm223_vm1, %v214_v8  ;;  %1029 = vmatprep.mubr.msk.f32.mxu0 %vm1082_vm0, %v1081_v0 }
  0x1a   : > { %1034 = vmatprep.mubr.msk.f32.mxu1 %vm1082_vm0, %v1081_v0  ;;  %1028 = vmatpush3.msra.mxu0 %v219_v49 }
  0x1b   : > { %1037 = vmatprep.subr.mxu0 %v1081_v0  ;;  %1033 = vmatpush3.msra.mxu1 %v220_v50 }
  0x1c   : > { %1042 = vmatprep.subr.mxu1 %v1081_v0 }
  0xe7   : > { %v296_v13 = vpop.f32.mrb[0].mxu0  ;;  %v372_v14 = vpop.f32.mrb[0].mxu1 }
  0xe8   : > { %v536_v15 = vsel %vm535_vm4, %v296_v13, -3.4028235e+38  ;;  %v1011_v16 = vpop.f32.mrb[1].mxu0  ;;  %v537_v17 = vsel %vm535_vm4, %v372_v14, -3.4028235e+38  ;;  %v1016_v18 = vpop.f32.mrb[1].mxu1 }
  0xe9   : > { %v540_v19 = vsel %vm223_vm1, %v536_v15, -inf  ;;  %v543_v21 = vsel %vm223_vm1, %v537_v17, -inf }
  0xea   : > { %541 = vmax.xlane.f32.xlu0 %v540_v19 }
  0xeb   : > { %v448_v20 = vpop.f32.mrb[2].mxu0 }
  0xec   : > { %v538_v22 = vsel %vm535_vm4, %v448_v20, -3.4028235e+38  ;;  %v1021_v23 = vpop.f32.mrb[3].mxu0  ;;  %v524_v24 = vpop.f32.mrb[2].mxu1 }
  0xed   : > { %v546_v25 = vsel %vm223_vm1, %v538_v22, -inf  ;;  %v539_v26 = vsel %vm535_vm4, %v524_v24, -3.4028235e+38  ;;  %v1026_v27 = vpop.f32.mrb[3].mxu1 }
  0xee   : > { %544 = vmax.xlane.f32.xlu0 %v543_v21  ;;  %547 = vmax.xlane.f32.xlu1 %v546_v25  ;;  %v549_v28 = vsel %vm223_vm1, %v539_v26, -inf }
  0xf2   : > { %550 = vmax.xlane.f32.xlu1 %v549_v28 }
 0x177   : > { %v542_v29 = vpop.xlane.xlu0 %541 }
 0x178   : > { %v552_v30 = vsub.f32 %v536_v15, %v542_v29 }
 0x17a   : > { %v556_v31 = vmul.f32 1.442695, %v552_v30 }
 0x17b   : > { %v545_v32 = vpop.xlane.xlu0 %544  ;;  %v548_v33 = vpop.xlane.xlu1 %547 }
 0x17c   : > { %1057 = vpow2.f32 %v556_v31  ;;  %v553_v34 = vsub.f32 %v537_v17, %v545_v32  ;;  %v554_v35 = vsub.f32 %v538_v22, %v548_v33 }
 0x17e   : > { %v558_v36 = vmul.f32 1.442695, %v553_v34  ;;  %v560_v37 = vmul.f32 1.442695, %v554_v35 }
 0x17f   : > { %v551_v38 = vpop.xlane.xlu1 %550 }
 0x180   : > { %1059 = vpow2.f32 %v558_v36  ;;  %v555_v39 = vsub.f32 %v539_v26, %v551_v38 }
 0x181   : > { %1061 = vpow2.f32 %v560_v37 }
 0x182   : > { %v562_v40 = vmul.f32 1.442695, %v555_v39 }
 0x184   : > { %1063 = vpow2.f32 %v562_v40 }
 0x186   : > { %v1058_v41 = vpop.eup %1057 }
 0x187   : > { %v564_v42 = vsel %vm223_vm1, %v1058_v41, 0.0 }
 0x188   : > { %565 = vadd.xlane.f32.xlu0 %v564_v42 }
 0x18a   : > { %v1060_v43 = vpop.eup %1059 }
 0x18b   : > { %v1062_v44 = vpop.eup %1061  ;;  %v567_v45 = vsel %vm223_vm1, %v1060_v43, 0.0 }
 0x18c   : > { %568 = vadd.xlane.f32.xlu1 %v567_v45  ;;  %v570_v46 = vsel %vm223_vm1, %v1062_v44, 0.0 }
 0x18d   : > { %571 = vadd.xlane.f32.xlu0 %v570_v46 }
 0x18e   : > { %v1064_v47 = vpop.eup %1063 }
 0x18f   : > { %v573_v48 = vsel %vm223_vm1, %v1064_v47, 0.0 }
 0x190   : > { %574 = vadd.xlane.f32.xlu1 %v573_v48 }
 0x215   : > { %v566_v51 = vpop.xlane.xlu0 %565 }
 0x216   : > { %1065 = vrcp.f32 %v566_v51 }
 0x219   : > { %v569_v52 = vpop.xlane.xlu1 %568 }
 0x21a   : > { %v572_v53 = vpop.xlane.xlu0 %571  ;;  %1067 = vrcp.f32 %v569_v52 }
 0x21b   : > { %1069 = vrcp.f32 %v572_v53 }
 0x21d   : > { %v575_v54 = vpop.xlane.xlu1 %574 }
 0x21e   : > { %1071 = vrcp.f32 %v575_v54 }
 0x220   : > { %v1066_v55 = vpop.eup %1065 }
 0x221   : > { %v577_v56 = vmul.f32 %v1066_v55, %v1058_v41 }
 0x223   : > { %1030 = vmatmul.mubr.msk.f32.vlgmr.msra.gmra.mrb[4].mxu0 %vm223_vm1, %v577_v56 }
 0x224   : > { %v1068_v58 = vpop.eup %1067  ;;  %1038 = vmatpush3.msra.mxu0 %v221_v57  ;;  %1039 = vmatprep.mubr.msk.f32.mxu0 %vm1082_vm0, %v1081_v0 }
 0x225   : > { %v1070_v59 = vpop.eup %1069  ;;  %v579_v60 = vmul.f32 %v1068_v58, %v1060_v43 }
 0x226   : > { %v581_v62 = vmul.f32 %v1070_v59, %v1062_v44 }
 0x227   : > { %1035 = vmatmul.mubr.msk.f32.vlgmr.msra.gmra.mrb[4].mxu1 %vm223_vm1, %v579_v60 }
 0x228   : > { %v1072_v63 = vpop.eup %1071  ;;  %1040 = vmatmul.mubr.msk.f32.vlgmr.msra.gmra.mrb[6].mxu0 %vm223_vm1, %v581_v62  ;;  %1043 = vmatpush3.msra.mxu1 %v222_v61 }
 0x229   : > { %v583_v1 = vmul.f32 %v1072_v63, %v1064_v47  ;;  %1044 = vmatprep.mubr.msk.f32.mxu1 %vm1082_vm0, %v1081_v0 }
 0x22b   : > { %1045 = vmatmul.mubr.msk.f32.vlgmr.msra.gmra.mrb[6].mxu1 %vm223_vm1, %v583_v1 }
 0x2f6   : > { %v653_v2 = vpop.f32.mrb[4].mxu0 }
 0x2f7   : > { %876 = vst.msk [vmem:[%s210_s26] sm:$0xff] %vm223_vm1, %v653_v2  ;;  %v1031_v3 = vpop.f32.mrb[5].mxu0 }
 0x2fa   : > { %v726_v4 = vpop.f32.mrb[4].mxu1 }
 0x2fb   : > { %877 = vst.msk [vmem:[%s210_s26 + $0x8] sm:$0xff] %vm223_vm1, %v726_v4  ;;  %v799_v5 = vpop.f32.mrb[6].mxu0  ;;  %v1036_v6 = vpop.f32.mrb[5].mxu1 }
 0x2fc   : > { %878 = vst.msk [vmem:[%s210_s26 + $0x10] sm:$0xff] %vm223_vm1, %v799_v5  ;;  %v1041_v7 = vpop.f32.mrb[7].mxu0 }
 0x2fe   : > { %v872_v8 = vpop.f32.mrb[6].mxu1 }
 0x2ff   : > { %879 = vst.msk [vmem:[%s210_s26 + $0x18] sm:$0xff] %vm223_vm1, %v872_v8  ;;  %v1046_v0 = vpop.f32.mrb[7].mxu1 }
 0x300 PF: > { %s13_s12 = sadd.s32 1, %s1079_s12  }
 0x301   : > { %p10_p4 = scmp.ge.s32.totalorder %s13_s12, 4  }
 0x303   :  { %12 = sbr.rel (!%p10_p4) target bundleno = 1 (0x1), region = 68 }

// kernel: structured_transformer_block.12
= control target key start
LH: loop header
LB: loop body
LE: loop exit
PB: predicated region body
PF: predicated region fallthrough
CT: control target
= control target key end

     0   :  { %vm27_vm0 = vcmask 261120   ;;  %vm342_vm1 = vcmask 785408   ;;  %s631_s0 = inlined_call_operand.vmem [shape: f32[80,32], index: 0, kind: input, shape index: {}]   ;;  %s632_s3 = inlined_call_operand.vmem [shape: f32[32,96], index: 3, kind: input, shape index: {}]   ;;  %s633_s1 = inlined_call_operand.vmem [shape: f32[1,32], index: 1, kind: input, shape index: {}]   ;;  %s634_s2 = inlined_call_operand.vmem [shape: f32[1,32], index: 2, kind: input, shape index: {}]   ;;  %s635_s4 = inlined_call_operand.vmem [shape: f32[80,96], index: 4, kind: output, shape index: {}]  }
   0x1   :  { %v17_v0 = vld [vmem:[%s631_s0] sm:$0xff]  ;;  %v19_v1 = vld [vmem:[%s631_s0 + $0x10] sm:$0xff]  ;;  %v18_v2 = vld [vmem:[%s631_s0 + $0x8] sm:$0xff] }
   0x2   :  { %v28_v3 = vsel %vm27_vm0, %v17_v0, 0.0  ;;  %v34_v4 = vsel %vm27_vm0, %v19_v1, 0.0  ;;  %v23_v5 = vld [vmem:[%s631_s0 + $0x30] sm:$0xff]  ;;  %v31_v6 = vsel %vm27_vm0, %v18_v2, 0.0  ;;  %v20_v8 = vld [vmem:[%s631_s0 + $0x18] sm:$0xff]  ;;  %v21_v12 = vld [vmem:[%s631_s0 + $0x20] sm:$0xff] }
   0x3   :  { %29 = vadd.xlane.f32.xlu0 %v28_v3  ;;  %35 = vadd.xlane.f32.xlu1 %v34_v4  ;;  %v46_v7 = vsel %vm27_vm0, %v23_v5, 0.0  ;;  %v24_v9 = vld [vmem:[%s631_s0 + $0x38] sm:$0xff]  ;;  %v37_v10 = vsel %vm27_vm0, %v20_v8, 0.0  ;;  %v25_v13 = vld [vmem:[%s631_s0 + $0x40] sm:$0xff]  ;;  %v40_v14 = vsel %vm27_vm0, %v21_v12, 0.0  ;;  %v22_v16 = vld [vmem:[%s631_s0 + $0x28] sm:$0xff] }
   0x4   :  { %v49_v11 = vsel %vm27_vm0, %v24_v9, 0.0  ;;  %v52_v15 = vsel %vm27_vm0, %v25_v13, 0.0  ;;  %v26_v17 = vld [vmem:[%s631_s0 + $0x48] sm:$0xff]  ;;  %v43_v18 = vsel %vm27_vm0, %v22_v16, 0.0 }
   0x5   :  { %v55_v19 = vsel %vm27_vm0, %v26_v17, 0.0 }
   0x7   :  { %32 = vadd.xlane.f32.xlu0 %v31_v6  ;;  %47 = vadd.xlane.f32.xlu1 %v46_v7  ;;  %v193_v6 = vld [vmem:[%s632_s3] sm:$0xff]  ;;  %v194_v7 = vld [vmem:[%s632_s3 + $0x8] sm:$0xff] }
   0xb   :  { %38 = vadd.xlane.f32.xlu0 %v37_v10  ;;  %50 = vadd.xlane.f32.xlu1 %v49_v11  ;;  %v196_v10 = vld [vmem:[%s632_s3 + $0x18] sm:$0xff] }
   0xf   :  { %41 = vadd.xlane.f32.xlu0 %v40_v14  ;;  %53 = vadd.xlane.f32.xlu1 %v52_v15 }
  0x13   :  { %44 = vadd.xlane.f32.xlu0 %v43_v18  ;;  %56 = vadd.xlane.f32.xlu1 %v55_v19 }
  0x90   :  { %v30_v20 = vpop.xlane.xlu0 %29  ;;  %v36_v21 = vpop.xlane.xlu1 %35 }
  0x91   :  { %v59_v22 = vmul.f32 0.03125, %v30_v20  ;;  %v61_v23 = vmul.f32 0.03125, %v36_v21 }
  0x93   :  { %v503_v24 = vsub.f32 %v17_v0, %v59_v22  ;;  %v505_v25 = vsub.f32 %v19_v1, %v61_v23 }
  0x94   :  { %v33_v26 = vpop.xlane.xlu0 %32  ;;  %v48_v27 = vpop.xlane.xlu1 %47 }
  0x95   :  { %v60_v28 = vmul.f32 0.03125, %v33_v26  ;;  %v65_v29 = vmul.f32 0.03125, %v48_v27  ;;  %v79_v30 = vmul.f32 %v503_v24, %v503_v24  ;;  %v81_v31 = vmul.f32 %v505_v25, %v505_v25 }
  0x97   :  { %v511_v32 = vsub.f32 %v18_v2, %v60_v28  ;;  %v513_v33 = vsub.f32 %v23_v5, %v65_v29  ;;  %v89_v34 = vsel %vm27_vm0, %v79_v30, 0.0  ;;  %v95_v37 = vsel %vm27_vm0, %v81_v31, 0.0 }
  0x98   :  { %90 = vadd.xlane.f32.xlu0 %v89_v34  ;;  %v39_v35 = vpop.xlane.xlu0 %38  ;;  %v51_v36 = vpop.xlane.xlu1 %50 }
  0x99   :  { %v62_v38 = vmul.f32 0.03125, %v39_v35  ;;  %v66_v39 = vmul.f32 0.03125, %v51_v36  ;;  %v80_v40 = vmul.f32 %v511_v32, %v511_v32  ;;  %v85_v41 = vmul.f32 %v513_v33, %v513_v33 }
  0x9b   :  { %v521_v42 = vsub.f32 %v20_v8, %v62_v38  ;;  %v523_v43 = vsub.f32 %v24_v9, %v66_v39  ;;  %v92_v44 = vsel %vm27_vm0, %v80_v40, 0.0  ;;  %v107_v47 = vsel %vm27_vm0, %v85_v41, 0.0  ;;  %v195_v9 = vld [vmem:[%s632_s3 + $0x10] sm:$0xff]  ;;  %v357_v38 = vld [vmem:[%s633_s1] ss:$0 sm:$0xff] }
  0x9c   :  { %96 = vadd.xlane.f32.xlu0 %v95_v37  ;;  %93 = vadd.xlane.f32.xlu1 %v92_v44  ;;  %v42_v45 = vpop.xlane.xlu0 %41  ;;  %v54_v46 = vpop.xlane.xlu1 %53  ;;  %v406_v8 = vpack.c.bf16 %v194_v7, %v193_v6  ;;  %v410_v11 = vpack.c.bf16 %v196_v10, %v195_v9 }
  0x9d   :  { %v63_v48 = vmul.f32 0.03125, %v42_v45  ;;  %v67_v49 = vmul.f32 0.03125, %v54_v46  ;;  %v82_v50 = vmul.f32 %v521_v42, %v521_v42  ;;  %v86_v51 = vmul.f32 %v523_v43, %v523_v43  ;;  %v358_v46 = vld [vmem:[%s634_s2] ss:$0 sm:$0xff] }
  0x9e   :  { %407 = vmatprep.subr.bf16.mxu0 %v406_v8  ;;  %414 = vmatprep.subr.bf16.mxu1 %v406_v8 }
  0x9f   :  { %v531_v52 = vsub.f32 %v21_v12, %v63_v48  ;;  %v533_v53 = vsub.f32 %v25_v13, %v67_v49  ;;  %v98_v54 = vsel %vm27_vm0, %v82_v50, 0.0  ;;  %v110_v57 = vsel %vm27_vm0, %v86_v51, 0.0  ;;  %409 = vmatpush3.bf16.msra.mxu0 %v406_v8  ;;  %416 = vmatpush3.bf16.msra.mxu1 %v406_v8 }
  0xa0   :  { %108 = vadd.xlane.f32.xlu1 %v107_v47  ;;  %99 = vadd.xlane.f32.xlu0 %v98_v54  ;;  %v45_v55 = vpop.xlane.xlu0 %44  ;;  %v57_v56 = vpop.xlane.xlu1 %56 }
  0xa1   :  { %v64_v58 = vmul.f32 0.03125, %v45_v55  ;;  %v68_v59 = vmul.f32 0.03125, %v57_v56  ;;  %v83_v60 = vmul.f32 %v531_v52, %v531_v52  ;;  %v87_v61 = vmul.f32 %v533_v53, %v533_v53  ;;  %411 = vmatprep.subr.bf16.mxu0 %v410_v11  ;;  %415 = vmatprep.subr.bf16.mxu1 %v410_v11 }
  0xa3   :  { %v541_v62 = vsub.f32 %v22_v16, %v64_v58  ;;  %v543_v63 = vsub.f32 %v26_v17, %v68_v59  ;;  %v101_v0 = vsel %vm27_vm0, %v83_v60, 0.0  ;;  %v113_v1 = vsel %vm27_vm0, %v87_v61, 0.0  ;;  %413 = vmatpush3.bf16.msra.mxu0 %v410_v11  ;;  %417 = vmatpush3.bf16.msra.mxu1 %v410_v11 }
  0xa4   :  { %111 = vadd.xlane.f32.xlu1 %v110_v57  ;;  %102 = vadd.xlane.f32.xlu0 %v101_v0 }
  0xa5   :  { %v84_v2 = vmul.f32 %v541_v62, %v541_v62  ;;  %v88_v3 = vmul.f32 %v543_v63, %v543_v63 }
  0xa7   :  { %v104_v4 = vsel %vm27_vm0, %v84_v2, 0.0  ;;  %v116_v5 = vsel %vm27_vm0, %v88_v3, 0.0 }
  0xa8   :  { %114 = vadd.xlane.f32.xlu1 %v113_v1  ;;  %105 = vadd.xlane.f32.xlu0 %v104_v4 }
  0xac   :  { %117 = vadd.xlane.f32.xlu1 %v116_v5 }
 0x125   :  { %v91_v12 = vpop.xlane.xlu0 %90 }
 0x126   :  { %v119_v13 = vmul.f32 0.03125, %v91_v12 }
 0x128   :  { %v129_v14 = vadd.f32 1e-05, %v119_v13 }
 0x129   :  { %v94_v15 = vpop.xlane.xlu1 %93  ;;  %v97_v16 = vpop.xlane.xlu0 %96 }
 0x12a   :  { %418 = vrsqrt.f32 %v129_v14  ;;  %v120_v17 = vmul.f32 0.03125, %v94_v15  ;;  %v121_v18 = vmul.f32 0.03125, %v97_v16 }
 0x12c   :  { %v130_v19 = vadd.f32 1e-05, %v120_v17  ;;  %v131_v20 = vadd.f32 1e-05, %v121_v18 }
 0x12d   :  { %v109_v21 = vpop.xlane.xlu1 %108  ;;  %v100_v22 = vpop.xlane.xlu0 %99 }
 0x12e   :  { %420 = vrsqrt.f32 %v130_v19  ;;  %v125_v23 = vmul.f32 0.03125, %v109_v21  ;;  %v122_v26 = vmul.f32 0.03125, %v100_v22 }
 0x12f   :  { %422 = vrsqrt.f32 %v131_v20 }
 0x130   :  { %v135_v27 = vadd.f32 1e-05, %v125_v23  ;;  %v132_v28 = vadd.f32 1e-05, %v122_v26 }
 0x131   :  { %v112_v29 = vpop.xlane.xlu1 %111  ;;  %v103_v30 = vpop.xlane.xlu0 %102 }
 0x132   :  { %424 = vrsqrt.f32 %v135_v27  ;;  %v126_v31 = vmul.f32 0.03125, %v112_v29  ;;  %v123_v34 = vmul.f32 0.03125, %v103_v30 }
 0x133   :  { %426 = vrsqrt.f32 %v132_v28 }
 0x134   :  { %v419_v35 = vpop.eup %418  ;;  %v136_v36 = vadd.f32 1e-05, %v126_v31  ;;  %v133_v37 = vadd.f32 1e-05, %v123_v34 }
 0x135   :  { %v115_v39 = vpop.xlane.xlu1 %114  ;;  %v106_v40 = vpop.xlane.xlu0 %105  ;;  %v149_v41 = vmul.f32 %v419_v35, %v503_v24 }
 0x136   :  { %428 = vrsqrt.f32 %v136_v36  ;;  %v127_v44 = vmul.f32 0.03125, %v115_v39  ;;  %v124_v45 = vmul.f32 0.03125, %v106_v40 }
 0x137   :  { %430 = vrsqrt.f32 %v133_v37  ;;  %v166_v47 = vmul.f32 %v357_v38, %v149_v41 }
 0x138   :  { %v421_v48 = vpop.eup %420  ;;  %v137_v49 = vadd.f32 1e-05, %v127_v44  ;;  %v134_v50 = vadd.f32 1e-05, %v124_v45 }
 0x139   :  { %v423_v51 = vpop.eup %422  ;;  %v118_v54 = vpop.xlane.xlu1 %117  ;;  %v183_v55 = vadd.f32 %v358_v46, %v166_v47  ;;  %v150_v56 = vmul.f32 %v421_v48, %v511_v32 }
 0x13a   :  { %432 = vrsqrt.f32 %v137_v49  ;;  %v128_v57 = vmul.f32 0.03125, %v118_v54  ;;  %v151_v24 = vmul.f32 %v423_v51, %v505_v25 }
 0x13b   :  { %434 = vrsqrt.f32 %v134_v50  ;;  %391 = vmatprep.mubr.msk.f32.mxu0 %vm27_vm0, %v183_v55  ;;  %v167_v58 = vmul.f32 %v357_v38, %v150_v56 }
 0x13c   :  { %v425_v59 = vpop.eup %424  ;;  %v138_v60 = vadd.f32 1e-05, %v128_v57  ;;  %v168_v61 = vmul.f32 %v357_v38, %v151_v24 }
 0x13d   :  { %v427_v0 = vpop.eup %426  ;;  %v184_v1 = vadd.f32 %v358_v46, %v167_v58  ;;  %v155_v2 = vmul.f32 %v425_v59, %v513_v33 }
 0x13e   :  { %436 = vrsqrt.f32 %v138_v60  ;;  %v185_v3 = vadd.f32 %v358_v46, %v168_v61  ;;  %v152_v4 = vmul.f32 %v427_v0, %v521_v42 }
 0x13f   :  { %392 = vmatmul.mubr.msk.f32.vlgmr.msra.gmra.mrb[0].mxu0 %vm27_vm0, %v184_v1  ;;  %v172_v32 = vmul.f32 %v357_v38, %v155_v2 }
 0x140   :  { %v429_v5 = vpop.eup %428  ;;  %394 = vmatprep.mubr.msk.f32.mxu0 %vm27_vm0, %v185_v3  ;;  %v169_v25 = vmul.f32 %v357_v38, %v152_v4 }
 0x141   :  { %v431_v6 = vpop.eup %430  ;;  %v189_v7 = vadd.f32 %v358_v46, %v172_v32  ;;  %v156_v8 = vmul.f32 %v429_v5, %v523_v43 }
 0x142   :  { %v186_v9 = vadd.f32 %v358_v46, %v169_v25  ;;  %v153_v10 = vmul.f32 %v431_v6, %v531_v52 }
 0x143   :  { %400 = vmatprep.mubr.msk.f32.mxu1 %vm27_vm0, %v189_v7  ;;  %v173_v33 = vmul.f32 %v357_v38, %v156_v8 }
 0x144   :  { %v433_v11 = vpop.eup %432  ;;  %395 = vmatmul.mubr.msk.f32.gmra.mrb[2].mxu0 %vm27_vm0, %v186_v9  ;;  %v170_v42 = vmul.f32 %v357_v38, %v153_v10 }
 0x145   :  { %v435_v12 = vpop.eup %434  ;;  %v190_v13 = vadd.f32 %v358_v46, %v173_v33  ;;  %v157_v14 = vmul.f32 %v433_v11, %v533_v53 }
 0x146   :  { %v187_v15 = vadd.f32 %v358_v46, %v170_v42  ;;  %v154_v16 = vmul.f32 %v435_v12, %v541_v62 }
 0x147   :  { %401 = vmatmul.mubr.msk.f32.vlgmr.msra.gmra.mrb[0].mxu1 %vm27_vm0, %v190_v13  ;;  %v174_v43 = vmul.f32 %v357_v38, %v157_v14 }
 0x148   :  { %v437_v17 = vpop.eup %436  ;;  %397 = vmatprep.mubr.msk.f32.mxu0 %vm27_vm0, %v187_v15  ;;  %v171_v52 = vmul.f32 %v357_v38, %v154_v16 }
 0x149   :  { %v191_v18 = vadd.f32 %v358_v46, %v174_v43  ;;  %v158_v19 = vmul.f32 %v437_v17, %v543_v63 }
 0x14a   :  { %v188_v20 = vadd.f32 %v358_v46, %v171_v52 }
 0x14b   :  { %403 = vmatprep.mubr.msk.f32.mxu1 %vm27_vm0, %v191_v18  ;;  %v175_v21 = vmul.f32 %v357_v38, %v158_v19 }
 0x14c   :  { %398 = vmatmul.mubr.msk.f32.gmra.mrb[4].mxu0 %vm27_vm0, %v188_v20 }
 0x14d   :  { %v192_v53 = vadd.f32 %v358_v46, %v175_v21 }
 0x14f   :  { %404 = vmatmul.mubr.msk.f32.gmra.mrb[2].mxu1 %vm27_vm0, %v192_v53 }
 0x212   :  { %v393_v62 = vpop.f32.mrb[0].mxu0 }
 0x213   :  { %344 = vst.msk [vmem:[%s635_s4 + $0x8] sm:$0xff] %vm342_vm1, %v393_v62  ;;  %v293_v22 = vpop.f32.mrb[1].mxu0 }
 0x214   :  { %343 = vst.msk [vmem:[%s635_s4] sm:$0xff] %vm342_vm1, %v293_v22 }
 0x217   :  { %v396_v63 = vpop.f32.mrb[2].mxu0 }
 0x218   :  { %346 = vst.msk [vmem:[%s635_s4 + $0x18] sm:$0xff] %vm342_vm1, %v396_v63  ;;  %v303_v23 = vpop.f32.mrb[3].mxu0 }
 0x219   :  { %345 = vst.msk [vmem:[%s635_s4 + $0x10] sm:$0xff] %vm342_vm1, %v303_v23 }
 0x21a   :  { %v402_v26 = vpop.f32.mrb[0].mxu1 }
 0x21b   :  { %350 = vst.msk [vmem:[%s635_s4 + $0x38] sm:$0xff] %vm342_vm1, %v402_v26  ;;  %v323_v27 = vpop.f32.mrb[1].mxu1 }
 0x21c   :  { %349 = vst.msk [vmem:[%s635_s4 + $0x30] sm:$0xff] %vm342_vm1, %v323_v27 }
 0x21f   :  { %v399_v28 = vpop.f32.mrb[4].mxu0 }
 0x220   :  { %348 = vst.msk [vmem:[%s635_s4 + $0x28] sm:$0xff] %vm342_vm1, %v399_v28  ;;  %v313_v29 = vpop.f32.mrb[5].mxu0 }
 0x221   :  { %347 = vst.msk [vmem:[%s635_s4 + $0x20] sm:$0xff] %vm342_vm1, %v313_v29 }
 0x222   :  { %v405_v30 = vpop.f32.mrb[2].mxu1 }
 0x223   :  { %352 = vst.msk [vmem:[%s635_s4 + $0x48] sm:$0xff] %vm342_vm1, %v405_v30  ;;  %v333_v31 = vpop.f32.mrb[3].mxu1 }
 0x224   :  { %351 = vst.msk [vmem:[%s635_s4 + $0x40] sm:$0xff] %vm342_vm1, %v333_v31 }

// kernel: structured_transformer_block.13
= control target key start
LH: loop header
LB: loop body
LE: loop exit
PB: predicated region body
PF: predicated region fallthrough
CT: control target
= control target key end

     0   :  { %s1120_s12 = smov 0   ;;  %s1207_s0 = inlined_call_operand.vmem [shape: f32[16,4,4,8], index: 0, kind: input, shape index: {}]   ;;  %s1208_s1 = inlined_call_operand.vmem [shape: f32[16,4,5,8], index: 1, kind: input, shape index: {}]   ;;  %s1209_s2 = inlined_call_operand.vmem [shape: f32[16,4,5,8], index: 2, kind: input, shape index: {}]   ;;  %s1210_s3 = inlined_call_operand.vmem [shape: f32[16,4,4,8], index: 3, kind: output, shape index: {}]  }
   0x1 LB: > { %s973_s13 = sadd.s32 4294967295, %s1096_s12   ;;  %p977_p0 = scmp.ge.s32.totalorder %s1096_s12, 1  ;;  %s1096_s12 = sphi %s1120_s12, %s13_s12  }
   0x2   : > { %p157_p1 = scmp.lt.s32.totalorder %s1096_s12, 17 }
   0x4   : > { %p158_p2 = pnand %p977_p0, %p157_p1 }
   0x5   : > { %p191_p3 = scmp.lt.s32.totalorder (!%p158_p2), %s973_s13, 15  ;;  %v1098_v0 = vmov (!%p158_p2), 0.0   ;;  %vm1099_vm0 = vmmov (!%p158_p2), 0   ;;  %vm223_vm1 = vcmask (!%p158_p2), 64512   ;;  %v528_v9 = vlaneseq (!%p158_p2) }
   0x6   : > { %161 = sbr.rel (%p158_p2) target bundleno = 768 (0x300), region = 32  ;;  %1024 = vmatprep.subr.mxu0 (!%p158_p2), %v1098_v0  ;;  %1026 = vmatprep.mubr.msk.f32.mxu0 (!%p158_p2), %vm1099_vm0, %v1098_v0  ;;  %vm538_vm3 = vcmask (!%p158_p2), 35840   ;;  %vm587_vm4 = vcmask (!%p158_p2), 1044480   ;;  %vm583_vm5 = vcmask (!%p158_p2), 39936   ;;  %vm889_vm6 = vcmask (!%p158_p2), 60416  }
   0x7   : > { %1029 = vmatprep.subr.mxu1 (!%p158_p2), %v1098_v0  ;;  %1031 = vmatprep.mubr.msk.f32.mxu1 (!%p158_p2), %vm1099_vm0, %v1098_v0  ;;  %v529_v10 = vshrl.u32 (!%p158_p2), %v528_v9, 7  ;;  %v531_v11 = vand.u32 (!%p158_p2), 127, %v528_v9 }
   0x9   : > { %v532_v12 = vadd.s32 (!%p158_p2), 1, %v529_v10 }
   0xb   : > { %vm533_vm2 = vcmp.le.s32.totalorder (!%p158_p2), %v531_v11, %v532_v12 }
   0xd   : > { %s1212_s13 = smov (!%p191_p3, %s973_s13), 15 }
   0xe   : > { %s1005_s14 = sshll.u32 %s1212_s13, 5  ;;  %s1004_s15 = sshll.u32 %s1212_s13, 4 }
   0xf   : > { %s200_s18 = scalar_lea.vmem %s1208_s1, %s1005_s14  ;;  %s195_s21 = scalar_lea.vmem %s1207_s0, %s1004_s15 }
  0x10   : > { %v215_v1 = vld [vmem:[%s200_s18] sm:$0x1f]  ;;  %v216_v2 = vld [vmem:[%s200_s18 + $0x8] sm:$0x1f]  ;;  %v217_v5 = vld [vmem:[%s200_s18 + $0x10] sm:$0x1f]  ;;  %s205_s24 = scalar_lea.vmem %s1209_s2, %s1005_s14  ;;  %s210_s27 = scalar_lea.vmem %s1210_s3, %s1004_s15 }
  0x11   : > { %1025 = vmatpush3.xpose.msk.msra.mxu0 %vm223_vm1, %v215_v1  ;;  %v211_v3 = vld [vmem:[%s195_s21] sm:$0xf]  ;;  %1030 = vmatpush3.xpose.msk.msra.mxu1 %vm223_vm1, %v216_v2  ;;  %v212_v4 = vld [vmem:[%s195_s21 + $0x4] sm:$0xf]  ;;  %v218_v6 = vld [vmem:[%s200_s18 + $0x18] sm:$0x1f] }
  0x12   : > { %1034 = vmatprep.subr.mxu0 %v1098_v0  ;;  %1039 = vmatprep.subr.mxu1 %v1098_v0  ;;  %v213_v7 = vld [vmem:[%s195_s21 + $0x8] sm:$0xf]  ;;  %v214_v8 = vld [vmem:[%s195_s21 + $0xc] sm:$0xf]  ;;  %v219_v49 = vld [vmem:[%s205_s24] sm:$0x1f] }
  0x13   : > { %v220_v50 = vld [vmem:[%s205_s24 + $0x8] sm:$0x1f]  ;;  %v221_v57 = vld [vmem:[%s205_s24 + $0x10] sm:$0x1f]  ;;  %v222_v61 = vld [vmem:[%s205_s24 + $0x18] sm:$0x1f] }
  0x14   : > { %1027 = vmatmul.mubr.msk.f32.vlgmr.msra.gmra.mrb[0].mxu0 %vm223_vm1, %v211_v3  ;;  %1032 = vmatmul.mubr.msk.f32.vlgmr.msra.gmra.mrb[0].mxu1 %vm223_vm1, %v212_v4 }
  0x15   : > { %1035 = vmatpush3.xpose.msk.msra.mxu0 %vm223_vm1, %v217_v5  ;;  %1036 = vmatprep.mubr.msk.f32.mxu0 %vm1099_vm0, %v1098_v0 }
  0x16   : > { %1040 = vmatpush3.xpose.msk.msra.mxu1 %vm223_vm1, %v218_v6  ;;  %1041 = vmatprep.mubr.msk.f32.mxu1 %vm1099_vm0, %v1098_v0 }
  0x17   : > { %1044 = vmatprep.subr.mxu0 %v1098_v0  ;;  %1049 = vmatprep.subr.mxu1 %v1098_v0 }
  0x18   : > { %1037 = vmatmul.mubr.msk.f32.vlgmr.msra.gmra.mrb[2].mxu0 %vm223_vm1, %v213_v7 }
  0x19   : > { %1042 = vmatmul.mubr.msk.f32.vlgmr.msra.gmra.mrb[2].mxu1 %vm223_vm1, %v214_v8  ;;  %1046 = vmatprep.mubr.msk.f32.mxu0 %vm1099_vm0, %v1098_v0 }
  0x1a   : > { %1051 = vmatprep.mubr.msk.f32.mxu1 %vm1099_vm0, %v1098_v0  ;;  %1045 = vmatpush3.msk.msra.mxu0 %vm587_vm4, %v219_v49 }
  0x1b   : > { %1054 = vmatprep.subr.mxu0 %v1098_v0  ;;  %1050 = vmatpush3.msk.msra.mxu1 %vm587_vm4, %v220_v50 }
  0x1c   : > { %1059 = vmatprep.subr.mxu1 %v1098_v0 }
  0xe7   : > { %v296_v13 = vpop.f32.mrb[0].mxu0  ;;  %v372_v14 = vpop.f32.mrb[0].mxu1 }
  0xe8   : > { %v534_v15 = vsel %vm533_vm2, %v296_v13, -3.4028235e+38  ;;  %v1028_v16 = vpop.f32.mrb[1].mxu0  ;;  %v535_v17 = vsel %vm533_vm2, %v372_v14, -3.4028235e+38  ;;  %v1033_v18 = vpop.f32.mrb[1].mxu1 }
  0xe9   : > { %v539_v19 = vsel %vm538_vm3, %v534_v15, -inf  ;;  %v542_v21 = vsel %vm538_vm3, %v535_v17, -inf }
  0xea   : > { %540 = vmax.xlane.f32.xlu0 %v539_v19 }
  0xeb   : > { %v448_v20 = vpop.f32.mrb[2].mxu0 }
  0xec   : > { %v536_v22 = vsel %vm533_vm2, %v448_v20, -3.4028235e+38  ;;  %v1038_v23 = vpop.f32.mrb[3].mxu0  ;;  %v524_v24 = vpop.f32.mrb[2].mxu1 }
  0xed   : > { %v545_v25 = vsel %vm538_vm3, %v536_v22, -inf  ;;  %v537_v26 = vsel %vm533_vm2, %v524_v24, -3.4028235e+38  ;;  %v1043_v27 = vpop.f32.mrb[3].mxu1 }
  0xee   : > { %543 = vmax.xlane.f32.xlu0 %v542_v21  ;;  %546 = vmax.xlane.f32.xlu1 %v545_v25  ;;  %v548_v28 = vsel %vm538_vm3, %v537_v26, -inf }
  0xf2   : > { %549 = vmax.xlane.f32.xlu1 %v548_v28 }
 0x177   : > { %v541_v29 = vpop.xlane.xlu0 %540 }
 0x178   : > { %v551_v30 = vsub.f32 %v534_v15, %v541_v29 }
 0x17a   : > { %v555_v31 = vmul.f32 1.442695, %v551_v30 }
 0x17b   : > { %v544_v32 = vpop.xlane.xlu0 %543  ;;  %v547_v33 = vpop.xlane.xlu1 %546 }
 0x17c   : > { %1074 = vpow2.f32 %v555_v31  ;;  %v552_v34 = vsub.f32 %v535_v17, %v544_v32  ;;  %v553_v35 = vsub.f32 %v536_v22, %v547_v33 }
 0x17e   : > { %v557_v36 = vmul.f32 1.442695, %v552_v34  ;;  %v559_v37 = vmul.f32 1.442695, %v553_v35 }
 0x17f   : > { %v550_v38 = vpop.xlane.xlu1 %549 }
 0x180   : > { %1076 = vpow2.f32 %v557_v36  ;;  %v554_v39 = vsub.f32 %v537_v26, %v550_v38 }
 0x181   : > { %1078 = vpow2.f32 %v559_v37 }
 0x182   : > { %v561_v40 = vmul.f32 1.442695, %v554_v39 }
 0x184   : > { %1080 = vpow2.f32 %v561_v40 }
 0x186   : > { %v1075_v41 = vpop.eup %1074 }
 0x187   : > { %v563_v42 = vsel %vm538_vm3, %v1075_v41, 0.0 }
 0x188   : > { %564 = vadd.xlane.f32.xlu0 %v563_v42 }
 0x18a   : > { %v1077_v43 = vpop.eup %1076 }
 0x18b   : > { %v1079_v44 = vpop.eup %1078  ;;  %v566_v45 = vsel %vm538_vm3, %v1077_v43, 0.0 }
 0x18c   : > { %567 = vadd.xlane.f32.xlu1 %v566_v45  ;;  %v569_v46 = vsel %vm538_vm3, %v1079_v44, 0.0 }
 0x18d   : > { %570 = vadd.xlane.f32.xlu0 %v569_v46 }
 0x18e   : > { %v1081_v47 = vpop.eup %1080 }
 0x18f   : > { %v572_v48 = vsel %vm538_vm3, %v1081_v47, 0.0 }
 0x190   : > { %573 = vadd.xlane.f32.xlu1 %v572_v48 }
 0x215   : > { %v565_v51 = vpop.xlane.xlu0 %564 }
 0x216   : > { %1082 = vrcp.f32 %v565_v51 }
 0x219   : > { %v568_v52 = vpop.xlane.xlu1 %567 }
 0x21a   : > { %v571_v53 = vpop.xlane.xlu0 %570  ;;  %1084 = vrcp.f32 %v568_v52 }
 0x21b   : > { %1086 = vrcp.f32 %v571_v53 }
 0x21d   : > { %v574_v54 = vpop.xlane.xlu1 %573 }
 0x21e   : > { %1088 = vrcp.f32 %v574_v54 }
 0x220   : > { %v1083_v55 = vpop.eup %1082 }
 0x221   : > { %v576_v56 = vmul.f32 %v1083_v55, %v1075_v41 }
 0x223   : > { %1047 = vmatmul.mubr.msk.f32.vlgmr.msra.gmra.mrb[4].mxu0 %vm583_vm5, %v576_v56 }
 0x224   : > { %v1085_v58 = vpop.eup %1084  ;;  %1055 = vmatpush3.msk.msra.mxu0 %vm587_vm4, %v221_v57  ;;  %1056 = vmatprep.mubr.msk.f32.mxu0 %vm1099_vm0, %v1098_v0 }
 0x225   : > { %v1087_v59 = vpop.eup %1086  ;;  %v578_v60 = vmul.f32 %v1085_v58, %v1077_v43 }
 0x226   : > { %v580_v62 = vmul.f32 %v1087_v59, %v1079_v44 }
 0x227   : > { %1052 = vmatmul.mubr.msk.f32.vlgmr.msra.gmra.mrb[4].mxu1 %vm583_vm5, %v578_v60 }
 0x228   : > { %v1089_v63 = vpop.eup %1088  ;;  %1057 = vmatmul.mubr.msk.f32.vlgmr.msra.gmra.mrb[6].mxu0 %vm583_vm5, %v580_v62  ;;  %1060 = vmatpush3.msk.msra.mxu1 %vm587_vm4, %v222_v61 }
 0x229   : > { %v582_v1 = vmul.f32 %v1089_v63, %v1081_v47  ;;  %1061 = vmatprep.mubr.msk.f32.mxu1 %vm1099_vm0, %v1098_v0 }
 0x22b   : > { %1062 = vmatmul.mubr.msk.f32.vlgmr.msra.gmra.mrb[6].mxu1 %vm583_vm5, %v582_v1 }
 0x2f6   : > { %v657_v2 = vpop.f32.mrb[4].mxu0 }
 0x2f7   : > { %890 = vst.msk [vmem:[%s210_s27] sm:$0xf] %vm889_vm6, %v657_v2  ;;  %v1048_v3 = vpop.f32.mrb[5].mxu0 }
 0x2fa   : > { %v733_v4 = vpop.f32.mrb[4].mxu1 }
 0x2fb   : > { %891 = vst.msk [vmem:[%s210_s27 + $0x4] sm:$0xf] %vm889_vm6, %v733_v4  ;;  %v809_v5 = vpop.f32.mrb[6].mxu0  ;;  %v1053_v6 = vpop.f32.mrb[5].mxu1 }
 0x2fc   : > { %892 = vst.msk [vmem:[%s210_s27 + $0x8] sm:$0xf] %vm889_vm6, %v809_v5  ;;  %v1058_v7 = vpop.f32.mrb[7].mxu0 }
 0x2fe   : > { %v885_v8 = vpop.f32.mrb[6].mxu1 }
 0x2ff   : > { %893 = vst.msk [vmem:[%s210_s27 + $0xc] sm:$0xf] %vm889_vm6, %v885_v8  ;;  %v1063_v0 = vpop.f32.mrb[7].mxu1 }
 0x300 PF: > { %s13_s12 = sadd.s32 1, %s1096_s12  }
 0x301   : > { %p10_p4 = scmp.ge.s32.totalorder %s13_s12, 18  }
 0x303   :  { %12 = sbr.rel (!%p10_p4) target bundleno = 1 (0x1), region = 68 }

// kernel: structured_transformer_block.14
= control target key start
LH: loop header
LB: loop body
LE: loop exit
PB: predicated region body
PF: predicated region fallthrough
CT: control target
= control target key end

     0   :  { %vm36_vm0 = vcmask 261120   ;;  %s375_s1 = inlined_call_operand.vmem [shape: f32[32,32], index: 1, kind: input, shape index: {}]   ;;  %s376_s0 = inlined_call_operand.vmem [shape: f32[64,32], index: 0, kind: input, shape index: {}]   ;;  %s377_s2 = inlined_call_operand.vmem [shape: f32[1,32], index: 2, kind: input, shape index: {}]   ;;  %s378_s3 = inlined_call_operand.vmem [shape: f32[64,32], index: 3, kind: input, shape index: {}]   ;;  %s379_s4 = inlined_call_operand.vmem [shape: f32[64,32], index: 4, kind: output, shape index: {}]  }
   0x1   :  { %v25_v0 = vld [vmem:[%s375_s1] sm:$0xff]  ;;  %v26_v1 = vld [vmem:[%s375_s1 + $0x8] sm:$0xff]  ;;  %v27_v2 = vld [vmem:[%s375_s1 + $0x10] sm:$0xff] }
   0x2   :  { %v235_v3 = vpack.c.bf16 %v26_v1, %v25_v0  ;;  %v28_v4 = vld [vmem:[%s375_s1 + $0x18] sm:$0xff]  ;;  %v17_v5 = vld [vmem:[%s376_s0] sm:$0xff]  ;;  %v18_v8 = vld [vmem:[%s376_s0 + $0x8] sm:$0xff] }
   0x3   :  { %v21_v6 = vld [vmem:[%s376_s0 + $0x20] sm:$0xff]  ;;  %v239_v7 = vpack.c.bf16 %v28_v4, %v27_v2  ;;  %223 = vmatprep.mubr.msk.f32.mxu0 %vm36_vm0, %v17_v5  ;;  %v22_v9 = vld [vmem:[%s376_s0 + $0x28] sm:$0xff]  ;;  %v19_v10 = vld [vmem:[%s376_s0 + $0x10] sm:$0xff] }
   0x4   :  { %229 = vmatprep.mubr.msk.f32.mxu1 %vm36_vm0, %v21_v6  ;;  %236 = vmatprep.subr.bf16.mxu0 %v235_v3  ;;  %v23_v11 = vld [vmem:[%s376_s0 + $0x30] sm:$0xff]  ;;  %v20_v12 = vld [vmem:[%s376_s0 + $0x18] sm:$0xff]  ;;  %v194_v14 = vld [vmem:[%s377_s2] ss:$0 sm:$0xff] }
   0x5   :  { %243 = vmatprep.subr.bf16.mxu1 %v235_v3  ;;  %238 = vmatpush3.bf16.msra.mxu0 %v235_v3  ;;  %v24_v13 = vld [vmem:[%s376_s0 + $0x38] sm:$0xff]  ;;  %v167_v16 = vld [vmem:[%s378_s3 + $0x8] sm:$0xff]  ;;  %v166_v22 = vld [vmem:[%s378_s3] sm:$0xff] }
   0x6   :  { %245 = vmatpush3.bf16.msra.mxu1 %v235_v3  ;;  %240 = vmatprep.subr.bf16.mxu0 %v239_v7  ;;  %v171_v18 = vld [vmem:[%s378_s3 + $0x28] sm:$0xff]  ;;  %v170_v24 = vld [vmem:[%s378_s3 + $0x20] sm:$0xff]  ;;  %v169_v32 = vld [vmem:[%s378_s3 + $0x18] sm:$0xff] }
   0x7   :  { %244 = vmatprep.subr.bf16.mxu1 %v239_v7  ;;  %v173_v34 = vld [vmem:[%s378_s3 + $0x38] sm:$0xff]  ;;  %v168_v38 = vld [vmem:[%s378_s3 + $0x10] sm:$0xff] }
   0x8   :  { %v172_v40 = vld [vmem:[%s378_s3 + $0x30] sm:$0xff] }
   0x9   :  { %242 = vmatpush3.bf16.msra.mxu0 %v239_v7 }
   0xa   :  { %246 = vmatpush3.bf16.msra.mxu1 %v239_v7 }
   0xc   :  { %224 = vmatmul.mubr.msk.f32.vlgmr.msra.gmra.mrb[0].mxu0 %vm36_vm0, %v18_v8 }
   0xd   :  { %230 = vmatmul.mubr.msk.f32.vlgmr.msra.gmra.mrb[0].mxu1 %vm36_vm0, %v22_v9  ;;  %226 = vmatprep.mubr.msk.f32.mxu0 %vm36_vm0, %v19_v10 }
   0xe   :  { %232 = vmatprep.mubr.msk.f32.mxu1 %vm36_vm0, %v23_v11 }
  0x10   :  { %227 = vmatmul.mubr.msk.f32.gmra.mrb[2].mxu0 %vm36_vm0, %v20_v12 }
  0x11   :  { %233 = vmatmul.mubr.msk.f32.gmra.mrb[2].mxu1 %vm36_vm0, %v24_v13 }
  0xdf   :  { %v225_v15 = vpop.f32.mrb[0].mxu0 }
  0xe0   :  { %v231_v17 = vpop.f32.mrb[0].mxu1  ;;  %v133_v19 = vadd.f32 %v225_v15, %v194_v14  ;;  %v127_v21 = vpop.f32.mrb[1].mxu0 }
  0xe1   :  { %v153_v20 = vadd.f32 %v231_v17, %v194_v14  ;;  %v147_v23 = vpop.f32.mrb[1].mxu1  ;;  %v128_v25 = vadd.f32 %v194_v14, %v127_v21 }
  0xe2   :  { %v148_v26 = vadd.f32 %v194_v14, %v147_v23  ;;  %v175_v27 = vadd.f32 %v167_v16, %v133_v19 }
  0xe3   :  { %v179_v28 = vadd.f32 %v171_v18, %v153_v20  ;;  %v174_v29 = vadd.f32 %v166_v22, %v128_v25  ;;  %v228_v31 = vpop.f32.mrb[2].mxu0 }
  0xe4   :  { %v178_v30 = vadd.f32 %v170_v24, %v148_v26  ;;  %v234_v33 = vpop.f32.mrb[2].mxu1  ;;  %183 = vst.msk [vmem:[%s379_s4 + $0x8] sm:$0xff] %vm36_vm0, %v175_v27  ;;  %v143_v35 = vadd.f32 %v228_v31, %v194_v14  ;;  %v137_v37 = vpop.f32.mrb[3].mxu0 }
  0xe5   :  { %187 = vst.msk [vmem:[%s379_s4 + $0x28] sm:$0xff] %vm36_vm0, %v179_v28  ;;  %v163_v36 = vadd.f32 %v234_v33, %v194_v14  ;;  %v157_v39 = vpop.f32.mrb[3].mxu1  ;;  %182 = vst.msk [vmem:[%s379_s4] sm:$0xff] %vm36_vm0, %v174_v29  ;;  %v138_v41 = vadd.f32 %v194_v14, %v137_v37 }
  0xe6   :  { %186 = vst.msk [vmem:[%s379_s4 + $0x20] sm:$0xff] %vm36_vm0, %v178_v30  ;;  %v158_v42 = vadd.f32 %v194_v14, %v157_v39  ;;  %v177_v43 = vadd.f32 %v169_v32, %v143_v35 }
  0xe7   :  { %v181_v44 = vadd.f32 %v173_v34, %v163_v36  ;;  %v176_v45 = vadd.f32 %v168_v38, %v138_v41 }
  0xe8   :  { %v180_v46 = vadd.f32 %v172_v40, %v158_v42  ;;  %185 = vst.msk [vmem:[%s379_s4 + $0x18] sm:$0xff] %vm36_vm0, %v177_v43 }
  0xe9   :  { %189 = vst.msk [vmem:[%s379_s4 + $0x38] sm:$0xff] %vm36_vm0, %v181_v44  ;;  %184 = vst.msk [vmem:[%s379_s4 + $0x10] sm:$0xff] %vm36_vm0, %v176_v45 }
  0xea   :  { %188 = vst.msk [vmem:[%s379_s4 + $0x30] sm:$0xff] %vm36_vm0, %v180_v46 }

// kernel: structured_transformer_block.15
= control target key start
LH: loop header
LB: loop body
LE: loop exit
PB: predicated region body
PF: predicated region fallthrough
CT: control target
= control target key end

     0   :  { %vm35_vm0 = vcmask 261120   ;;  %s1089_s0 = inlined_call_operand.vmem [shape: f32[64,32], index: 0, kind: input, shape index: {}]   ;;  %s1090_s1 = inlined_call_operand.vmem [shape: f32[1,32], index: 1, kind: input, shape index: {}]   ;;  %s1091_s2 = inlined_call_operand.vmem [shape: f32[1,32], index: 2, kind: input, shape index: {}]   ;;  %s1092_s3 = inlined_call_operand.vmem [shape: f32[32,128], index: 3, kind: input, shape index: {}]   ;;  %s1093_s4 = inlined_call_operand.vmem [shape: f32[1,128], index: 4, kind: input, shape index: {}]   ;;  %s1094_s5 = inlined_call_operand.vmem [shape: f32[128,32], index: 5, kind: input, shape index: {}]   ;;  %s1095_s6 = inlined_call_operand.vmem [shape: f32[1,32], index: 6, kind: input, shape index: {}]   ;;  %s1096_s7 = inlined_call_operand.hbm [shape: f32[64,32], index: 7, kind: output, shape index: {}]  }
   0x1   :  { %v816_v0 = vld [vmem:[%s1089_s0] sm:$0xff]  ;;  %v821_v1 = vld [vmem:[%s1089_s0 + $0x10] sm:$0xff]  ;;  %v826_v2 = vld [vmem:[%s1089_s0 + $0x8] sm:$0xff] }
   0x2   :  { %v36_v3 = vsel %vm35_vm0, %v816_v0, 0.0  ;;  %v42_v4 = vsel %vm35_vm0, %v821_v1, 0.0  ;;  %v835_v5 = vld [vmem:[%s1089_s0 + $0x18] sm:$0xff]  ;;  %v39_v6 = vsel %vm35_vm0, %v826_v2, 0.0 }
   0x3   :  { %37 = vadd.xlane.f32.xlu0 %v36_v3  ;;  %43 = vadd.xlane.f32.xlu1 %v42_v4  ;;  %v45_v7 = vsel %vm35_vm0, %v835_v5, 0.0 }
   0x4   :  { %12 = vsyncpa [#allocation3], 0  ;;  %v844_v8 = vld [vmem:[%s1089_s0 + $0x20] sm:$0xff]  ;;  %v849_v9 = vld [vmem:[%s1089_s0 + $0x28] sm:$0xff] }
   0x5   :  { %v48_v10 = vsel %vm35_vm0, %v844_v8, 0.0  ;;  %v51_v11 = vsel %vm35_vm0, %v849_v9, 0.0  ;;  %v858_v12 = vld [vmem:[%s1089_s0 + $0x30] sm:$0xff]  ;;  %v863_v13 = vld [vmem:[%s1089_s0 + $0x38] sm:$0xff]  ;;  %v171_v56 = vld [vmem:[%s1092_s3] sm:$0xff] }
   0x6   :  { %v54_v14 = vsel %vm35_vm0, %v858_v12, 0.0  ;;  %v57_v15 = vsel %vm35_vm0, %v863_v13, 0.0  ;;  %v172_v57 = vld [vmem:[%s1092_s3 + $0x8] sm:$0xff]  ;;  %v173_v59 = vld [vmem:[%s1092_s3 + $0x10] sm:$0xff]  ;;  %v174_v60 = vld [vmem:[%s1092_s3 + $0x18] sm:$0xff] }
   0x7   :  { %40 = vadd.xlane.f32.xlu0 %v39_v6  ;;  %46 = vadd.xlane.f32.xlu1 %v45_v7  ;;  %v655_v58 = vpack.c.bf16 %v172_v57, %v171_v56  ;;  %v659_v61 = vpack.c.bf16 %v174_v60, %v173_v59 }
   0x9   :  { %656 = vmatprep.subr.bf16.mxu0 %v655_v58 }
   0xa   :  { %658 = vmatpush3.bf16.msra.mxu0 %v655_v58 }
   0xb   :  { %49 = vadd.xlane.f32.xlu0 %v48_v10  ;;  %52 = vadd.xlane.f32.xlu1 %v51_v11 }
   0xc   :  { %660 = vmatprep.subr.bf16.mxu0 %v659_v61 }
   0xe   :  { %662 = vmatpush3.bf16.msra.mxu0 %v659_v61 }
   0xf   :  { %55 = vadd.xlane.f32.xlu0 %v54_v14  ;;  %58 = vadd.xlane.f32.xlu1 %v57_v15 }
  0x90   :  { %v38_v16 = vpop.xlane.xlu0 %37  ;;  %v44_v17 = vpop.xlane.xlu1 %43 }
  0x91   :  { %v61_v18 = vmul.f32 0.03125, %v38_v16  ;;  %v63_v19 = vmul.f32 0.03125, %v44_v17 }
  0x93   :  { %v870_v20 = vsub.f32 %v816_v0, %v61_v18  ;;  %v873_v21 = vsub.f32 %v821_v1, %v63_v19 }
  0x94   :  { %v41_v22 = vpop.xlane.xlu0 %40  ;;  %v47_v23 = vpop.xlane.xlu1 %46 }
  0x95   :  { %v62_v24 = vmul.f32 0.03125, %v41_v22  ;;  %v64_v25 = vmul.f32 0.03125, %v47_v23  ;;  %v77_v26 = vmul.f32 %v870_v20, %v870_v20  ;;  %v79_v27 = vmul.f32 %v873_v21, %v873_v21 }
  0x97   :  { %v880_v28 = vsub.f32 %v826_v2, %v62_v24  ;;  %v883_v29 = vsub.f32 %v835_v5, %v64_v25  ;;  %v85_v30 = vsel %vm35_vm0, %v77_v26, 0.0  ;;  %v91_v33 = vsel %vm35_vm0, %v79_v27, 0.0 }
  0x98   :  { %86 = vadd.xlane.f32.xlu0 %v85_v30  ;;  %v50_v31 = vpop.xlane.xlu0 %49  ;;  %v53_v32 = vpop.xlane.xlu1 %52 }
  0x99   :  { %v65_v34 = vmul.f32 0.03125, %v50_v31  ;;  %v66_v35 = vmul.f32 0.03125, %v53_v32  ;;  %v78_v36 = vmul.f32 %v880_v28, %v880_v28  ;;  %v80_v37 = vmul.f32 %v883_v29, %v883_v29  ;;  %v543_v32 = vld [vmem:[%s1090_s1] ss:$0 sm:$0xff] }
  0x9b   :  { %v892_v38 = vsub.f32 %v844_v8, %v65_v34  ;;  %v895_v39 = vsub.f32 %v849_v9, %v66_v35  ;;  %v88_v40 = vsel %vm35_vm0, %v78_v36, 0.0  ;;  %v94_v43 = vsel %vm35_vm0, %v80_v37, 0.0  ;;  %v544_v36 = vld [vmem:[%s1091_s2] ss:$0 sm:$0xff] }
  0x9c   :  { %92 = vadd.xlane.f32.xlu0 %v91_v33  ;;  %89 = vadd.xlane.f32.xlu1 %v88_v40  ;;  %v56_v41 = vpop.xlane.xlu0 %55  ;;  %v59_v42 = vpop.xlane.xlu1 %58 }
  0x9d   :  { %v67_v44 = vmul.f32 0.03125, %v56_v41  ;;  %v68_v45 = vmul.f32 0.03125, %v59_v42  ;;  %v81_v46 = vmul.f32 %v892_v38, %v892_v38  ;;  %v82_v47 = vmul.f32 %v895_v39, %v895_v39 }
  0x9f   :  { %v904_v48 = vsub.f32 %v858_v12, %v67_v44  ;;  %v907_v49 = vsub.f32 %v863_v13, %v68_v45  ;;  %v97_v50 = vsel %vm35_vm0, %v81_v46, 0.0  ;;  %v100_v51 = vsel %vm35_vm0, %v82_v47, 0.0 }
  0xa0   :  { %95 = vadd.xlane.f32.xlu1 %v94_v43  ;;  %98 = vadd.xlane.f32.xlu0 %v97_v50 }
  0xa1   :  { %v83_v52 = vmul.f32 %v904_v48, %v904_v48  ;;  %v84_v53 = vmul.f32 %v907_v49, %v907_v49 }
  0xa3   :  { %v103_v54 = vsel %vm35_vm0, %v83_v52, 0.0  ;;  %v106_v55 = vsel %vm35_vm0, %v84_v53, 0.0 }
  0xa4   :  { %101 = vadd.xlane.f32.xlu1 %v100_v51  ;;  %104 = vadd.xlane.f32.xlu0 %v103_v54 }
  0xa8   :  { %107 = vadd.xlane.f32.xlu1 %v106_v55 }
 0x125   :  { %v87_v62 = vpop.xlane.xlu0 %86 }
 0x126   :  { %v109_v63 = vmul.f32 0.03125, %v87_v62 }
 0x128   :  { %v117_v3 = vadd.f32 1e-05, %v109_v63 }
 0x129   :  { %v90_v4 = vpop.xlane.xlu1 %89  ;;  %v93_v6 = vpop.xlane.xlu0 %92 }
 0x12a   :  { %714 = vrsqrt.f32 %v117_v3  ;;  %v110_v7 = vmul.f32 0.03125, %v90_v4  ;;  %v111_v10 = vmul.f32 0.03125, %v93_v6  ;;  %v384_v6 = vld [vmem:[%s1094_s5 + $0x8] sm:$0xff] }
 0x12c   :  { %v118_v11 = vadd.f32 1e-05, %v110_v7  ;;  %v119_v14 = vadd.f32 1e-05, %v111_v10  ;;  %v386_v10 = vld [vmem:[%s1094_s5 + $0x18] sm:$0xff] }
 0x12d   :  { %v96_v15 = vpop.xlane.xlu1 %95  ;;  %v99_v16 = vpop.xlane.xlu0 %98 }
 0x12e   :  { %716 = vrsqrt.f32 %v118_v11  ;;  %v112_v17 = vmul.f32 0.03125, %v96_v15  ;;  %v113_v18 = vmul.f32 0.03125, %v99_v16  ;;  %v388_v15 = vld [vmem:[%s1094_s5 + $0x28] sm:$0xff] }
 0x12f   :  { %718 = vrsqrt.f32 %v119_v14  ;;  %v387_v14 = vld [vmem:[%s1094_s5 + $0x20] sm:$0xff] }
 0x130   :  { %v120_v19 = vadd.f32 1e-05, %v112_v17  ;;  %v121_v22 = vadd.f32 1e-05, %v113_v18  ;;  %v671_v16 = vpack.c.bf16 %v388_v15, %v387_v14  ;;  %v389_v17 = vld [vmem:[%s1094_s5 + $0x30] sm:$0xff]  ;;  %v390_v18 = vld [vmem:[%s1094_s5 + $0x38] sm:$0xff] }
 0x131   :  { %v102_v23 = vpop.xlane.xlu1 %101  ;;  %v105_v24 = vpop.xlane.xlu0 %104 }
 0x132   :  { %720 = vrsqrt.f32 %v120_v19  ;;  %v114_v25 = vmul.f32 0.03125, %v102_v23  ;;  %v115_v26 = vmul.f32 0.03125, %v105_v24  ;;  %v675_v19 = vpack.c.bf16 %v390_v18, %v389_v17  ;;  %v392_v23 = vld [vmem:[%s1094_s5 + $0x48] sm:$0xff] }
 0x133   :  { %722 = vrsqrt.f32 %v121_v22  ;;  %v391_v22 = vld [vmem:[%s1094_s5 + $0x40] sm:$0xff] }
 0x134   :  { %v715_v27 = vpop.eup %714  ;;  %v122_v30 = vadd.f32 1e-05, %v114_v25  ;;  %v123_v31 = vadd.f32 1e-05, %v115_v26  ;;  %v679_v24 = vpack.c.bf16 %v392_v23, %v391_v22  ;;  %v393_v25 = vld [vmem:[%s1094_s5 + $0x50] sm:$0xff]  ;;  %v394_v26 = vld [vmem:[%s1094_s5 + $0x58] sm:$0xff] }
 0x135   :  { %v108_v33 = vpop.xlane.xlu1 %107  ;;  %v133_v34 = vmul.f32 %v715_v27, %v870_v20  ;;  %v683_v27 = vpack.c.bf16 %v394_v26, %v393_v25 }
 0x136   :  { %724 = vrsqrt.f32 %v122_v30  ;;  %v116_v35 = vmul.f32 0.03125, %v108_v33  ;;  %v395_v30 = vld [vmem:[%s1094_s5 + $0x60] sm:$0xff]  ;;  %v397_v33 = vld [vmem:[%s1094_s5 + $0x70] sm:$0xff] }
 0x137   :  { %726 = vrsqrt.f32 %v123_v31  ;;  %v148_v37 = vmul.f32 %v543_v32, %v133_v34  ;;  %v396_v31 = vld [vmem:[%s1094_s5 + $0x68] sm:$0xff]  ;;  %v398_v34 = vld [vmem:[%s1094_s5 + $0x78] sm:$0xff] }
 0x138   :  { %v717_v40 = vpop.eup %716  ;;  %v124_v41 = vadd.f32 1e-05, %v116_v35  ;;  %v691_v35 = vpack.c.bf16 %v398_v34, %v397_v33 }
 0x139   :  { %v719_v42 = vpop.eup %718  ;;  %v163_v43 = vadd.f32 %v544_v36, %v148_v37  ;;  %v134_v44 = vmul.f32 %v717_v40, %v880_v28 }
 0x13a   :  { %728 = vrsqrt.f32 %v124_v41  ;;  %v135_v45 = vmul.f32 %v719_v42, %v873_v21 }
 0x13b   :  { %599 = vmatprep.mubr.msk.f32.mxu0 %vm35_vm0, %v163_v43  ;;  %v149_v20 = vmul.f32 %v543_v32, %v134_v44 }
 0x13c   :  { %v721_v46 = vpop.eup %720  ;;  %v150_v47 = vmul.f32 %v543_v32, %v135_v45 }
 0x13d   :  { %v723_v50 = vpop.eup %722  ;;  %v164_v51 = vadd.f32 %v544_v36, %v149_v20  ;;  %v136_v52 = vmul.f32 %v721_v46, %v883_v29 }
 0x13e   :  { %v165_v53 = vadd.f32 %v544_v36, %v150_v47  ;;  %v137_v54 = vmul.f32 %v723_v50, %v892_v38 }
 0x13f   :  { %600 = vmatmul.mubr.msk.f32.vlgmr.msra.gmra.mrb[0].mxu0 %vm35_vm0, %v164_v51  ;;  %v151_v55 = vmul.f32 %v543_v32, %v136_v52 }
 0x140   :  { %v725_v56 = vpop.eup %724  ;;  %602 = vmatprep.mubr.msk.f32.mxu0 %vm35_vm0, %v165_v53  ;;  %v152_v28 = vmul.f32 %v543_v32, %v137_v54 }
 0x141   :  { %v727_v21 = vpop.eup %726  ;;  %v166_v57 = vadd.f32 %v544_v36, %v151_v55  ;;  %v138_v58 = vmul.f32 %v725_v56, %v895_v39 }
 0x142   :  { %v167_v59 = vadd.f32 %v544_v36, %v152_v28  ;;  %v139_v60 = vmul.f32 %v727_v21, %v904_v48  ;;  %v383_v48 = vld [vmem:[%s1094_s5] sm:$0xff] }
 0x143   :  { %603 = vmatmul.mubr.msk.f32.gmra.mrb[2].mxu0 %vm35_vm0, %v166_v57  ;;  %v153_v29 = vmul.f32 %v543_v32, %v138_v58  ;;  %v663_v7 = vpack.c.bf16 %v384_v6, %v383_v48 }
 0x144   :  { %v729_v61 = vpop.eup %728  ;;  %605 = vmatprep.mubr.msk.f32.mxu0 %vm35_vm0, %v167_v59  ;;  %v154_v38 = vmul.f32 %v543_v32, %v139_v60 }
 0x145   :  { %v168_v62 = vadd.f32 %v544_v36, %v153_v29  ;;  %v140_v63 = vmul.f32 %v729_v61, %v907_v49  ;;  %664 = vmatprep.subr.bf16.mxu0 %v663_v7  ;;  %695 = vmatprep.subr.bf16.mxu1 %v663_v7  ;;  %v385_v49 = vld [vmem:[%s1094_s5 + $0x10] sm:$0xff] }
 0x146   :  { %v169_v3 = vadd.f32 %v544_v36, %v154_v38  ;;  %666 = vmatpush3.bf16.msra.mxu0 %v663_v7  ;;  %703 = vmatpush3.bf16.msra.mxu1 %v663_v7  ;;  %v667_v11 = vpack.c.bf16 %v386_v10, %v385_v49 }
 0x147   :  { %606 = vmatmul.mubr.msk.f32.gmra.mrb[4].mxu0 %vm35_vm0, %v168_v62  ;;  %v155_v4 = vmul.f32 %v543_v32, %v140_v63  ;;  %v687_v32 = vpack.c.bf16 %v396_v31, %v395_v30 }
 0x148   :  { %608 = vmatprep.mubr.msk.f32.mxu0 %vm35_vm0, %v169_v3  ;;  %668 = vmatprep.subr.bf16.mxu0 %v667_v11 }
 0x149   :  { %v170_v39 = vadd.f32 %v544_v36, %v155_v4  ;;  %696 = vmatprep.subr.bf16.mxu1 %v667_v11  ;;  %v545_v36 = vld [vmem:[%s1093_s4] ss:$0 sm:$0xff] }
 0x14a   :  { %670 = vmatpush3.bf16.msra.mxu0 %v667_v11  ;;  %704 = vmatpush3.bf16.msra.mxu1 %v667_v11 }
 0x14b   :  { %609 = vmatmul.mubr.msk.f32.gmra.mrb[6].mxu0 %vm35_vm0, %v170_v39  ;;  %672 = vmatprep.subr.bf16.mxu0 %v671_v16 }
 0x14c   :  { %697 = vmatprep.subr.bf16.mxu1 %v671_v16 }
 0x14e   :  { %674 = vmatpush3.bf16.msra.mxu0 %v671_v16  ;;  %705 = vmatpush3.bf16.msra.mxu1 %v671_v16 }
 0x14f   :  { %676 = vmatprep.subr.bf16.mxu0 %v675_v19  ;;  %698 = vmatprep.subr.bf16.mxu1 %v675_v19 }
 0x152   :  { %678 = vmatpush3.bf16.msra.mxu0 %v675_v19  ;;  %706 = vmatpush3.bf16.msra.mxu1 %v675_v19 }
 0x153   :  { %680 = vmatprep.subr.bf16.mxu0 %v679_v24  ;;  %699 = vmatprep.subr.bf16.mxu1 %v679_v24 }
 0x156   :  { %682 = vmatpush3.bf16.msra.mxu0 %v679_v24  ;;  %707 = vmatpush3.bf16.msra.mxu1 %v679_v24 }
 0x157   :  { %684 = vmatprep.subr.bf16.mxu0 %v683_v27  ;;  %700 = vmatprep.subr.bf16.mxu1 %v683_v27 }
 0x15a   :  { %686 = vmatpush3.bf16.msra.mxu0 %v683_v27  ;;  %708 = vmatpush3.bf16.msra.mxu1 %v683_v27 }
 0x15b   :  { %688 = vmatprep.subr.bf16.mxu0 %v687_v32  ;;  %701 = vmatprep.subr.bf16.mxu1 %v687_v32 }
 0x15e   :  { %690 = vmatpush3.bf16.msra.mxu0 %v687_v32  ;;  %709 = vmatpush3.bf16.msra.mxu1 %v687_v32 }
 0x15f   :  { %692 = vmatprep.subr.bf16.mxu0 %v691_v35  ;;  %702 = vmatprep.subr.bf16.mxu1 %v691_v35 }
 0x162   :  { %694 = vmatpush3.bf16.msra.mxu0 %v691_v35  ;;  %710 = vmatpush3.bf16.msra.mxu1 %v691_v35 }
 0x212   :  { %v601_v37 = vpop.f32.mrb[0].mxu0 }
 0x213   :  { %v1002_v40 = vadd.f32 %v601_v37, %v545_v36  ;;  %v272_v41 = vpop.f32.mrb[1].mxu0 }
 0x214   :  { %v1004_v42 = vadd.f32 %v545_v36, %v272_v41 }
 0x215   :  { %v312_v43 = vmul.f32 %v1002_v40, %v1002_v40 }
 0x216   :  { %v311_v44 = vmul.f32 %v1004_v42, %v1004_v42  ;;  %v604_v45 = vpop.f32.mrb[2].mxu0 }
 0x217   :  { %v320_v20 = vmul.f32 %v312_v43, %v1002_v40  ;;  %v1011_v46 = vadd.f32 %v604_v45, %v545_v36  ;;  %v282_v47 = vpop.f32.mrb[3].mxu0 }
 0x218   :  { %v319_v50 = vmul.f32 %v311_v44, %v1004_v42  ;;  %v1014_v51 = vadd.f32 %v545_v36, %v282_v47 }
 0x219   :  { %v328_v52 = vmul.f32 0.044715, %v320_v20  ;;  %v314_v53 = vmul.f32 %v1011_v46, %v1011_v46 }
 0x21a   :  { %v327_v54 = vmul.f32 0.044715, %v319_v50  ;;  %v313_v55 = vmul.f32 %v1014_v51, %v1014_v51  ;;  %v607_v56 = vpop.f32.mrb[4].mxu0 }
 0x21b   :  { %v336_v28 = vadd.f32 %v328_v52, %v1002_v40  ;;  %v322_v21 = vmul.f32 %v314_v53, %v1011_v46  ;;  %v1022_v57 = vadd.f32 %v607_v56, %v545_v36  ;;  %v292_v58 = vpop.f32.mrb[5].mxu0 }
 0x21c   :  { %v335_v59 = vadd.f32 %v327_v54, %v1004_v42  ;;  %v321_v60 = vmul.f32 %v313_v55, %v1014_v51  ;;  %v1026_v29 = vadd.f32 %v545_v36, %v292_v58 }
 0x21d   :  { %v344_v61 = vmul.f32 0.7978846, %v336_v28  ;;  %v330_v38 = vmul.f32 0.044715, %v322_v21  ;;  %v316_v62 = vmul.f32 %v1022_v57, %v1022_v57 }
 0x21e   :  { %v343_v63 = vmul.f32 0.7978846, %v335_v59  ;;  %v315_v3 = vmul.f32 %v1026_v29, %v1026_v29  ;;  %v610_v4 = vpop.f32.mrb[6].mxu0  ;;  %v329_v39 = vmul.f32 0.044715, %v321_v60 }
 0x21f   :  { %730 = vtanh.f32 %v344_v61  ;;  %v338_v48 = vadd.f32 %v330_v38, %v1011_v46  ;;  %v324_v6 = vmul.f32 %v316_v62, %v1022_v57  ;;  %v1034_v7 = vadd.f32 %v610_v4, %v545_v36  ;;  %v302_v49 = vpop.f32.mrb[7].mxu0 }
 0x220   :  { %v323_v10 = vmul.f32 %v315_v3, %v1026_v29  ;;  %v1037_v11 = vadd.f32 %v545_v36, %v302_v49  ;;  %732 = vtanh.f32 %v343_v63  ;;  %v337_v14 = vadd.f32 %v329_v39, %v1014_v51 }
 0x221   :  { %v346_v15 = vmul.f32 0.7978846, %v338_v48  ;;  %v332_v16 = vmul.f32 0.044715, %v324_v6  ;;  %v318_v17 = vmul.f32 %v1034_v7, %v1034_v7 }
 0x222   :  { %v331_v18 = vmul.f32 0.044715, %v323_v10  ;;  %v317_v19 = vmul.f32 %v1037_v11, %v1037_v11  ;;  %v345_v22 = vmul.f32 0.7978846, %v337_v14  ;;  %v554_v10 = vld [vmem:[%s1095_s6] ss:$0 sm:$0xff] }
 0x223   :  { %v340_v23 = vadd.f32 %v332_v16, %v1022_v57  ;;  %v326_v24 = vmul.f32 %v318_v17, %v1034_v7  ;;  %734 = vtanh.f32 %v346_v15  ;;  %s770_s6 = smov [#allocation2]  }
 0x224   :  { %v339_v25 = vadd.f32 %v331_v18, %v1026_v29  ;;  %v325_v26 = vmul.f32 %v317_v19, %v1037_v11  ;;  %736 = vtanh.f32 %v345_v22  ;;  %s532_s9 = sshll.u32 %s770_s6, 4  ;;  %s533_s9 = int_to_ptr.vmem [resolvable:$true] %s532_s9 }
 0x225   :  { %v348_v27 = vmul.f32 0.7978846, %v340_v23  ;;  %v334_v30 = vmul.f32 0.044715, %v326_v24  ;;  %s746_s10 = scalar_lea.vmem %s533_s9, 1024  ;;  %p751_p1 = scmp.lt.s32.totalorder %s533_s9, %s533_s9 }
 0x226   :  { %v347_v31 = vmul.f32 0.7978846, %v339_v25  ;;  %v333_v32 = vmul.f32 0.044715, %v325_v26  ;;  %p747_p0 = scmp.ne.s32.totalorder %s533_s9, %s746_s10  ;;  %p752_p2 = scmp.lt.s32.totalorder %s746_s10, %s746_s10 }
 0x227   :  { %v342_v33 = vadd.f32 %v334_v30, %v1034_v7  ;;  %738 = vtanh.f32 %v348_v27 }
 0x228   :  { %v341_v34 = vadd.f32 %v333_v32, %v1037_v11  ;;  %740 = vtanh.f32 %v347_v31  ;;  %p753_p3 = por %p752_p2, %p751_p1 }
 0x229   :  { %v731_v35 = vpop.eup %730  ;;  %v350_v36 = vmul.f32 0.7978846, %v342_v33 }
 0x22a   :  { %v733_v37 = vpop.eup %732  ;;  %v360_v41 = vadd.f32 1.0, %v731_v35  ;;  %v349_v43 = vmul.f32 0.7978846, %v341_v34  ;;  %p754_p4 = pnand %p753_p3, %p747_p0 }
 0x22b   :  { %v359_v44 = vadd.f32 1.0, %v733_v37  ;;  %742 = vtanh.f32 %v350_v36 }
 0x22c   :  { %v368_v45 = vmul.f32 0.5, %v360_v41  ;;  %744 = vtanh.f32 %v349_v43 }
 0x22d   :  { %v735_v20 = vpop.eup %734  ;;  %v367_v47 = vmul.f32 0.5, %v359_v44 }
 0x22e   :  { %v737_v50 = vpop.eup %736  ;;  %v362_v52 = vadd.f32 1.0, %v735_v20  ;;  %v376_v55 = vmul.f32 %v368_v45, %v1002_v40 }
 0x22f   :  { %v375_v53 = vmul.f32 %v367_v47, %v1004_v42  ;;  %v361_v54 = vadd.f32 1.0, %v737_v50 }
 0x230   :  { %v370_v56 = vmul.f32 0.5, %v362_v52 }
 0x231   :  { %v739_v28 = vpop.eup %738  ;;  %643 = vmatprep.mubr.f32.mxu0 %v375_v53  ;;  %v369_v21 = vmul.f32 0.5, %v361_v54 }
 0x232   :  { %v741_v58 = vpop.eup %740  ;;  %644 = vmatmul.mubr.f32.vlgmr.msra.gmra.mrb[8].mxu0 %v376_v55  ;;  %v364_v59 = vadd.f32 1.0, %v739_v28  ;;  %v378_v38 = vmul.f32 %v370_v56, %v1011_v46 }
 0x233   :  { %v377_v60 = vmul.f32 %v369_v21, %v1014_v51  ;;  %v363_v61 = vadd.f32 1.0, %v741_v58 }
 0x234   :  { %v372_v62 = vmul.f32 0.5, %v364_v59 }
 0x235   :  { %v743_v63 = vpop.eup %742  ;;  %646 = vmatprep.mubr.f32.mxu1 %v377_v60  ;;  %v371_v3 = vmul.f32 0.5, %v363_v61 }
 0x236   :  { %v745_v42 = vpop.eup %744  ;;  %647 = vmatmul.mubr.f32.vlgmr.msra.gmra.mrb[0].mxu1 %v378_v38  ;;  %v366_v4 = vadd.f32 1.0, %v743_v63  ;;  %v380_v48 = vmul.f32 %v372_v62, %v1022_v57 }
 0x237   :  { %v379_v40 = vmul.f32 %v371_v3, %v1026_v29  ;;  %v365_v39 = vadd.f32 1.0, %v745_v42 }
 0x238   :  { %v374_v6 = vmul.f32 0.5, %v366_v4 }
 0x239   :  { %649 = vmatprep.mubr.f32.mxu1 %v379_v40  ;;  %v373_v49 = vmul.f32 0.5, %v365_v39 }
 0x23a   :  { %650 = vmatmul.mubr.f32.gmra.mrb[2].mxu1 %v380_v48  ;;  %v382_v46 = vmul.f32 %v374_v6, %v1034_v7 }
 0x23b   :  { %v381_v51 = vmul.f32 %v373_v49, %v1037_v11 }
 0x23d   :  { %652 = vmatprep.mubr.f32.mxu1 %v381_v51 }
 0x23e   :  { %653 = vmatmul.mubr.f32.gmra.mrb[4].mxu1 %v382_v46 }
 0x305   :  { %v645_v14 = vpop.f32.mrb[8].mxu0 }
 0x306   :  { %v478_v15 = vadd.f32 %v645_v14, %v554_v10  ;;  %v472_v29 = vpop.f32.mrb[9].mxu0 }
 0x307   :  { %v473_v16 = vadd.f32 %v554_v10, %v472_v29 }
 0x308   :  { %v512_v57 = vadd.f32 %v478_v15, %v826_v2 }
 0x309   :  { %v511_v17 = vadd.f32 %v473_v16, %v816_v0  ;;  %v648_v18 = vpop.f32.mrb[0].mxu1 }
 0x30a   :  { %520 = vst.msk [vmem:[#allocation2 + $0x8] sm:$0xff] %vm35_vm0, %v512_v57  ;;  %v488_v11 = vadd.f32 %v648_v18, %v554_v10  ;;  %v482_v19 = vpop.f32.mrb[1].mxu1 }
 0x30b   :  { %519 = vst.msk [vmem:[#allocation2] sm:$0xff] %vm35_vm0, %v511_v17  ;;  %v483_v7 = vadd.f32 %v554_v10, %v482_v19 }
 0x30c   :  { %v514_v22 = vadd.f32 %v488_v11, %v835_v5 }
 0x30d   :  { %v513_v23 = vadd.f32 %v483_v7, %v821_v1  ;;  %v651_v24 = vpop.f32.mrb[2].mxu1 }
 0x30e   :  { %522 = vst.msk [vmem:[#allocation2 + $0x18] sm:$0xff] %vm35_vm0, %v514_v22  ;;  %v498_v25 = vadd.f32 %v651_v24, %v554_v10  ;;  %v492_v26 = vpop.f32.mrb[3].mxu1 }
 0x30f   :  { %521 = vst.msk [vmem:[#allocation2 + $0x10] sm:$0xff] %vm35_vm0, %v513_v23  ;;  %v493_v0 = vadd.f32 %v554_v10, %v492_v26 }
 0x310   :  { %v516_v2 = vadd.f32 %v498_v25, %v849_v9 }
 0x311   :  { %v515_v27 = vadd.f32 %v493_v0, %v844_v8  ;;  %v654_v30 = vpop.f32.mrb[4].mxu1 }
 0x312   :  { %524 = vst.msk [vmem:[#allocation2 + $0x28] sm:$0xff] %vm35_vm0, %v516_v2  ;;  %v508_v31 = vadd.f32 %v654_v30, %v554_v10  ;;  %v502_v32 = vpop.f32.mrb[5].mxu1 }
 0x313   :  { %523 = vst.msk [vmem:[#allocation2 + $0x20] sm:$0xff] %vm35_vm0, %v515_v27  ;;  %v503_v1 = vadd.f32 %v554_v10, %v502_v32 }
 0x314   :  { %v518_v5 = vadd.f32 %v508_v31, %v863_v13 }
 0x315   :  { %v517_v33 = vadd.f32 %v503_v1, %v858_v12 }
 0x316   :  { %526 = vst.msk [vmem:[#allocation2 + $0x38] sm:$0xff] %vm35_vm0, %v518_v5 }
 0x317   :  { %525 = vst.msk [vmem:[#allocation2 + $0x30] sm:$0xff] %vm35_vm0, %v517_v33 }
 0x318   :  { %757 = shalt.err (!%p754_p4)
}
 0x319   :  { %s758_s13 = scalar_lea.hbm %s1096_s7, 1024 }
 0x31a   :  { %p759_p5 = scmp.ne.s32.totalorder %s1096_s7, %s758_s13  ;;  %p762_p6 = scmp.lt.u32.totalorder %s758_s13, %s1096_s7 }
 0x31c   :  { %p764_p7 = pnand %p762_p6, %p759_p5 }
 0x31e   :  { %767 = shalt.err (!%p764_p7)
}
 0x31f   :  { %s771_s17 = smov 128   ;;  %s772_s18 = smov 8  }
 0x320   :  { %538 = dma.vmem_to_hbm [thread:$0]  %s533_s9, 1024, %s1096_s7, [#allocation3], %s771_s17, %s771_s17, %s772_s18  }
 0x321   :  { %768 = dma.done.wait [#allocation3], 1024  }
 0x322   :  { %769 = vsyncadd [#allocation3], 4294966272 }
 0x323   :  { %542 = vsyncpa [#allocation3], 1 }

</bundles_post_ra>
